<compile_context>
chip_gen: v5e
topology: v5e:2x2
jax: 0.10.0
libtpu: 0.0.40
codegen_flags: <defaults>
</compile_context>

<pallas_src>
import functools

import jax
import jax.numpy as jnp
from jax.experimental import pallas as pl
from jax.experimental.pallas import tpu as pltpu


LANE = 128          # lane-dense padded feature width
QOS_NUMBER = 4
CONSTRAINT_NUMBER = 2


# ---------------------------------------------------------------------------
# Padding helpers (host-side, one-time prep)
# ---------------------------------------------------------------------------

def _round_up(n, m):
    return ((n + m - 1) // m) * m


def _pad2(a, rows, cols, dtype=jnp.float32):
    out = jnp.zeros((rows, cols), dtype)
    return out.at[: a.shape[0], : a.shape[1]].set(a.astype(dtype))


def _pad_row(a, cols):
    out = jnp.zeros((1, cols), jnp.float32)
    return out.at[0, : a.shape[0]].set(a.astype(jnp.float32))


def _full_spec(shape):
    nd = len(shape)
    return pl.BlockSpec(shape, lambda i, _nd=nd: (0,) * _nd)


# ---------------------------------------------------------------------------
# Fused forward kernel (single pallas_call)
#
# Row-pack layout (rows_ref, f32 [R,128]):
#   per GIN layer i:  5i   : (1+eps_i) broadcast row
#                     5i+1 : BN1 scale         5i+2 : BN1 shift (+ b1 folded)
#                     5i+3 : BN2 scale         5i+4 : BN2 shift (+ b2 folded)
#   base = 5*num_gin; per GCN layer i: base+2i : BN scale, base+2i+1 : shift(+b)
#   tail = base + 2*num_gcn:  nodeLin bias ;  tail+1 : serviceLin bias
#
# Weight-pack layout (W_ref, bf16 [K,128,128]):
#   [0..Lg)      gin w1     [Lg..2Lg)    gin w2
#   [2Lg..2Lg+Lc) service (or noService) lins
#   2Lg+Lc       nodeLin    2Lg+Lc+1     serviceLin
# ---------------------------------------------------------------------------

def _fused_forward_kernel(*refs, num_gin, num_gcn, is_service):
    if is_service:
        (h0_ref, A_ref, hs0_ref, adjs_ref, P_ref, Ps_ref,
         W_ref, rows_ref, out_ref) = refs
    else:
        (h0_ref, A_ref, hs0_ref, P_ref, Ps_ref,
         W_ref, rows_ref, out_ref) = refs
        adjs_ref = None

    f32 = jnp.float32
    bf16 = jnp.bfloat16

    def row(k):                       # static row index -> [1, 128] f32
        return rows_ref[k:k + 1, :]

    # ---- node branch: GIN layers (sum-aggregation folded into the layer) ----
    h = h0_ref[...]                   # f32 activations, epilogue stays f32
    A = A_ref[...]                    # bf16 adjacency (MXU operand)
    for i in range(num_gin):
        r = 5 * i
        # agg = A @ h + (1 + eps) * h   (no A + (1+eps)I materialization)
        agg = (jnp.dot(A, h.astype(bf16), preferred_element_type=f32)
               + row(r) * h)
        # MLP: Lin1 -> BN1 -> ReLU  (bias folded into BN shift)
        y = jnp.dot(agg.astype(bf16), W_ref[i], preferred_element_type=f32)
        y = jnp.maximum(y * row(r + 1) + row(r + 2), 0.0)
        # Lin2, then nodeBatchNorms[i] + ReLU (bias folded into BN shift)
        h = jnp.dot(y.astype(bf16), W_ref[num_gin + i],
                    preferred_element_type=f32)
        h = jnp.maximum(h * row(r + 3) + row(r + 4), 0.0)

    # ---- service branch: GCN layers (or plain Linear stack) ----
    hs = hs0_ref[...]
    if is_service:
        adjs = adjs_ref[...]          # bf16 normalized adjacency
    rb = 5 * num_gin
    wb = 2 * num_gin
    for i in range(num_gcn):
        xw = jnp.dot(hs.astype(bf16), W_ref[wb + i],
                     preferred_element_type=f32)
        if is_service:
            xw = jnp.dot(adjs, xw.astype(bf16), preferred_element_type=f32)
        hs = jnp.maximum(xw * row(rb + 2 * i) + row(rb + 2 * i + 1), 0.0)

    # ---- heads ----
    wh = wb + num_gcn
    rh = rb + 2 * num_gcn
    h = jnp.dot(h.astype(bf16), W_ref[wh], preferred_element_type=f32) + row(rh)
    hs = jnp.dot(hs.astype(bf16), W_ref[wh + 1],
                 preferred_element_type=f32) + row(rh + 1)

    # ---- scatter-mean pooling as matmuls against row-normalized one-hots ----
    pooled_x = jnp.dot(P_ref[...], h.astype(bf16),
                       preferred_element_type=f32)     # [G_pad, F]
    pooled_s = jnp.dot(Ps_ref[...], hs.astype(bf16),
                       preferred_element_type=f32)     # [O_pad, F]

    # ---- final: sigmoid(pooled_x @ pooled_s^T)  (trans_b contraction) ----
    logits = jax.lax.dot_general(
        pooled_x.astype(bf16), pooled_s.astype(bf16),
        dimension_numbers=(((1,), (1,)), ((), ())),
        preferred_element_type=f32)
    out_ref[...] = jax.nn.sigmoid(logits)


# ---------------------------------------------------------------------------
# Parameters (deterministic synthetic init; shapes follow Net.__init__)
# ---------------------------------------------------------------------------

def init_params(key, *, emb_ch, hidden_ch, num_gin, num_gcn):
    keys = iter(jax.random.split(key, 256))

    def nrm(shape, s=0.1):
        return jax.random.normal(next(keys), shape, jnp.float32) * s

    params = {
        "node_emb": nrm((100, emb_ch), 0.3),      # NodeEncoder.embeddings[0]
        "service_emb": nrm((100, emb_ch), 0.3),   # serviceEncoder.embeddings[0]
    }

    gin = []
    in_ch = emb_ch + CONSTRAINT_NUMBER * 3
    for _ in range(num_gin):
        gin.append(dict(
            eps=jnp.asarray(0.0, jnp.float32),               # GINConv train_eps init
            w1=nrm((in_ch, 2 * hidden_ch)),                  # Linear(in, 2H)
            b1=nrm((2 * hidden_ch,), 0.05),
            bn1_scale=1.0 + nrm((2 * hidden_ch,), 0.02),     # BN(2H) folded (eval)
            bn1_shift=nrm((2 * hidden_ch,), 0.02),
            w2=nrm((2 * hidden_ch, hidden_ch)),              # Linear(2H, H)
            b2=nrm((hidden_ch,), 0.05),
            bn2_scale=1.0 + nrm((hidden_ch,), 0.02),         # nodeBatchNorms folded
            bn2_shift=nrm((hidden_ch,), 0.02),
        ))
        in_ch = hidden_ch
    params["gin"] = gin

    gcn, noservice, gcn_bn = [], [], []
    in_ch = emb_ch + QOS_NUMBER
    for _ in range(num_gcn):
        gcn.append(dict(w=nrm((in_ch, 2 * hidden_ch)),        # GCNConv
                        b=nrm((2 * hidden_ch,), 0.05)))
        noservice.append(dict(w=nrm((in_ch, 2 * hidden_ch)),  # noServicesLins
                              b=nrm((2 * hidden_ch,), 0.05)))
        gcn_bn.append(dict(scale=1.0 + nrm((2 * hidden_ch,), 0.02),
                           shift=nrm((2 * hidden_ch,), 0.02)))
        in_ch = 2 * hidden_ch
    params["gcn"] = gcn
    params["noservice"] = noservice
    params["gcn_bn"] = gcn_bn

    params["node_lin_w"] = nrm((hidden_ch, hidden_ch))
    params["node_lin_b"] = nrm((hidden_ch,), 0.05)
    params["service_lin_w"] = nrm((2 * hidden_ch, hidden_ch))
    params["service_lin_b"] = nrm((hidden_ch,), 0.05)
    return params


def fold_and_pad_params(params, *, num_gin, num_gcn, is_service):
    """Fold Linear bias into BatchNorm shift, zero-pad to 128 lanes, and pack:
       one bf16 [K,128,128] weight stack + one f32 [R,128] row stack."""
    F = LANE
    svc_key = "gcn" if is_service else "noservice"

    weights = []
    for i in range(num_gin):
        weights.append(_pad2(params["gin"][i]["w1"], F, F))
    for i in range(num_gin):
        weights.append(_pad2(params["gin"][i]["w2"], F, F))
    for i in range(num_gcn):
        weights.append(_pad2(params[svc_key][i]["w"], F, F))
    weights.append(_pad2(params["node_lin_w"], F, F))
    weights.append(_pad2(params["service_lin_w"], F, F))
    W = jnp.stack(weights).astype(jnp.bfloat16)               # [K, F, F] bf16

    rows = []
    for i in range(num_gin):
        p = params["gin"][i]
        rows.append((1.0 + p["eps"]) * jnp.ones((1, F), jnp.float32))
        rows.append(_pad_row(p["bn1_scale"], F))
        rows.append(_pad_row(p["b1"] * p["bn1_scale"] + p["bn1_shift"], F))
        rows.append(_pad_row(p["bn2_scale"], F))
        rows.append(_pad_row(p["b2"] * p["bn2_scale"] + p["bn2_shift"], F))
    for i in range(num_gcn):
        pw = params[svc_key][i]
        pbn = params["gcn_bn"][i]
        rows.append(_pad_row(pbn["scale"], F))
        rows.append(_pad_row(pw["b"] * pbn["scale"] + pbn["shift"], F))
    rows.append(_pad_row(params["node_lin_b"], F))
    rows.append(_pad_row(params["service_lin_b"], F))

    R = len(rows)
    rows_arr = jnp.concatenate(rows, axis=0)
    rows_arr = jnp.pad(rows_arr, ((0, _round_up(R, 8) - R), (0, 0)))
    return W, rows_arr


# ---------------------------------------------------------------------------
# Forward pass (glue in JAX, all compute in one pallas_call)
# ---------------------------------------------------------------------------

def net_forward(params, data, *, num_gin, num_gcn, out_channels, num_graphs,
                is_service=True):
    x = data["x"]                       # [N, 1 + 6], col 0 = categorical id
    edge_index = data["edge_index"]     # [2, E]  (row 0 = src, row 1 = dst)
    x_s = data["x_service"]             # [Ns, 1 + 4]
    ei_s = data["edge_index_service"]   # [2, Es]
    ew_s = data["edge_attr_service"]    # [Es]
    batch = data["batch"]               # [N]

    N = x.shape[0]
    Ns = x_s.shape[0]
    F = LANE
    bf16 = jnp.bfloat16
    # lane-dense padding (128) on the node/service axes: unmasked vld/vst AND
    # >=128 MXU rows; 8-row sublane padding only where the axis never becomes
    # a lane dim (graph axis of P / out).
    N_pad = _round_up(N, LANE)
    Ns_pad = _round_up(Ns, LANE)
    G_pad = _round_up(num_graphs, 8)
    O_pad = LANE

    # ---- embedding gather + concat (glue) ----
    node_ids = x[:, 0].astype(jnp.int32)
    h0 = jnp.concatenate(
        [params["node_emb"][node_ids], x[:, 1:].astype(jnp.float32)], axis=-1)
    svc_ids = x_s[:, 0].astype(jnp.int32)
    hs0 = jnp.concatenate(
        [params["service_emb"][svc_ids], x_s[:, 1:].astype(jnp.float32)], axis=-1)

    # ---- dense adjacency: A[i, j] = #edges j -> i ----
    A = jnp.zeros((N, N), jnp.float32).at[edge_index[1], edge_index[0]].add(1.0)

    # ---- GCN normalized adjacency: D^-1/2 (A_w + I) D^-1/2 (only if used) ----
    if is_service:
        As = jnp.zeros((Ns, Ns), jnp.float32).at[ei_s[1], ei_s[0]].add(ew_s)
        Ahat = As + jnp.eye(Ns, dtype=jnp.float32)
        deg = Ahat.sum(axis=1)
        dinv = jnp.where(deg > 0, jax.lax.rsqrt(deg), 0.0)
        norm_adj = Ahat * dinv[:, None] * dinv[None, :]

    # ---- scatter(reduce='mean') pooling matrices (row-normalized one-hots) ----
    P = (batch[None, :] == jnp.arange(num_graphs)[:, None]).astype(jnp.float32)
    P = P / jnp.maximum(P.sum(axis=1, keepdims=True), 1.0)
    service_batch = jnp.tile(jnp.arange(out_channels), num_graphs)   # len == Ns
    Ps = (service_batch[None, :] == jnp.arange(out_channels)[:, None]
          ).astype(jnp.float32)
    Ps = Ps / jnp.maximum(Ps.sum(axis=1, keepdims=True), 1.0)

    W, rows_arr = fold_and_pad_params(params, num_gin=num_gin, num_gcn=num_gcn,
                                      is_service=is_service)

    arrays = [
        _pad2(h0, N_pad, F),                     # f32 activations
        _pad2(A, N_pad, N_pad, bf16),            # bf16 MXU operand
        _pad2(hs0, Ns_pad, F),
    ]
    if is_service:                               # skipped entirely otherwise
        arrays.append(_pad2(norm_adj, Ns_pad, Ns_pad, bf16))
    arrays += [
        _pad2(P, G_pad, N_pad, bf16),
        _pad2(Ps, O_pad, Ns_pad, bf16),
        W,                                       # [K,128,128] bf16 weight stack
        rows_arr,                                # [R,128] f32 scale/shift stack
    ]

    # explicit VMEM budget from actual resident footprint (+ double-buffer
    # headroom), capped at v7x's 64 MiB physical VMEM.
    footprint = sum(int(a.size) * a.dtype.itemsize for a in arrays)
    footprint += G_pad * O_pad * 4
    vmem_limit = int(min(64 * 1024 * 1024,
                         max(4 * 1024 * 1024, 2 * footprint + (1 << 21))))

    kern = functools.partial(_fused_forward_kernel, num_gin=num_gin,
                             num_gcn=num_gcn, is_service=is_service)

    out_padded = pl.pallas_call(
        kern,
        grid=(1,),
        in_specs=[_full_spec(a.shape) for a in arrays],
        out_specs=_full_spec((G_pad, O_pad)),
        out_shape=jax.ShapeDtypeStruct((G_pad, O_pad), jnp.float32),
        compiler_params=pltpu.CompilerParams(
            dimension_semantics=("arbitrary",),
            vmem_limit_bytes=vmem_limit),
    )(*arrays)

    # slice the lane-dense padded slab back to [num_graphs, out_channels]
    return out_padded[:num_graphs, :out_channels]


# ---------------------------------------------------------------------------
# Demo
# ---------------------------------------------------------------------------

if __name__ == "__main__":
    EMB_CH, HIDDEN_CH, OUT_CH = 8, 16, 4
    NUM_GIN, NUM_GCN = 2, 2
    NUM_GRAPHS = 2
    N_NODES = 8
    N_SERVICE = NUM_GRAPHS * OUT_CH  # scatter over serviceBatch requires this

    key = jax.random.PRNGKey(0)
    kp, k1, k2, k3, k4, k5 = jax.random.split(key, 6)

    params = init_params(kp, emb_ch=EMB_CH, hidden_ch=HIDDEN_CH,
                         num_gin=NUM_GIN, num_gcn=NUM_GCN)

    node_ids = jax.random.randint(k1, (N_NODES, 1), 0, 100)
    node_feats = jax.random.normal(k2, (N_NODES, CONSTRAINT_NUMBER * 3), jnp.float32)
    x = jnp.concatenate([node_ids.astype(jnp.float32), node_feats], axis=1)

    svc_ids = jax.random.randint(k3, (N_SERVICE, 1), 0, 100)
    svc_feats = jax.random.normal(k4, (N_SERVICE, QOS_NUMBER), jnp.float32)
    x_service = jnp.concatenate([svc_ids.astype(jnp.float32), svc_feats], axis=1)

    # two ring graphs of 4 nodes each (bidirectional edges)
    src = jnp.array([0, 1, 2, 3, 4, 5, 6, 7, 1, 2, 3, 0, 5, 6, 7, 4], jnp.int32)
    dst = jnp.array([1, 2, 3, 0, 5, 6, 7, 4, 0, 1, 2, 3, 4, 5, 6, 7], jnp.int32)
    edge_index = jnp.stack([src, dst])

    # service graph: one ring over all service nodes, with weights
    src_s = jnp.array([0, 1, 2, 3, 4, 5, 6, 7, 7, 0, 1, 2, 3, 4, 5, 6], jnp.int32)
    dst_s = jnp.array([1, 2, 3, 4, 5, 6, 7, 0, 0, 1, 2, 3, 4, 5, 6, 7], jnp.int32)
    edge_index_service = jnp.stack([src_s, dst_s])
    edge_attr_service = jax.random.uniform(k5, (src_s.shape[0],), jnp.float32, 0.5, 1.5)

    batch = jnp.array([0, 0, 0, 0, 1, 1, 1, 1], jnp.int32)

    data = dict(x=x, edge_index=edge_index, x_service=x_service,
                edge_index_service=edge_index_service,
                edge_attr_service=edge_attr_service, batch=batch)

    out = net_forward(params, data, num_gin=NUM_GIN, num_gcn=NUM_GCN,
                      out_channels=OUT_CH, num_graphs=NUM_GRAPHS, is_service=True)
    out = jax.block_until_ready(out)

    assert out.shape == (NUM_GRAPHS, OUT_CH)
    assert bool(jnp.all(jnp.isfinite(out)))
    assert bool(jnp.all((out >= 0.0) & (out <= 1.0)))
    print("KERNEL_OK")
</pallas_src>

<mosaic_0001>
module attributes {stable_mosaic.version = 11 : i64} {
  func.func @_fused_forward_kernel(%arg0: i32, %arg1: memref<128x128xf32, #tpu.memory_space<vmem>>, %arg2: memref<128x128xbf16, #tpu.memory_space<vmem>>, %arg3: memref<128x128xf32, #tpu.memory_space<vmem>>, %arg4: memref<128x128xbf16, #tpu.memory_space<vmem>>, %arg5: memref<8x128xbf16, #tpu.memory_space<vmem>>, %arg6: memref<128x128xbf16, #tpu.memory_space<vmem>>, %arg7: memref<8x128x128xbf16, #tpu.memory_space<vmem>>, %arg8: memref<16x128xf32, #tpu.memory_space<vmem>>, %arg9: memref<8x128xf32, #tpu.memory_space<vmem>>) attributes {dimension_semantics = [#tpu.dimension_semantics<arbitrary>], iteration_bounds = array<i64: 1>, scalar_prefetch = 0 : i64, scratch_operands = 0 : i64, tpu.core_type = #tpu.core_type<tc>, window_params = [{pipeline_mode = #tpu.pipeline_mode<synchronous>, transform_indices = @transform_0, window_bounds = array<i64: 128, 128>}, {pipeline_mode = #tpu.pipeline_mode<synchronous>, transform_indices = @transform_1, window_bounds = array<i64: 128, 128>}, {pipeline_mode = #tpu.pipeline_mode<synchronous>, transform_indices = @transform_2, window_bounds = array<i64: 128, 128>}, {pipeline_mode = #tpu.pipeline_mode<synchronous>, transform_indices = @transform_3, window_bounds = array<i64: 128, 128>}, {pipeline_mode = #tpu.pipeline_mode<synchronous>, transform_indices = @transform_4, window_bounds = array<i64: 8, 128>}, {pipeline_mode = #tpu.pipeline_mode<synchronous>, transform_indices = @transform_5, window_bounds = array<i64: 128, 128>}, {pipeline_mode = #tpu.pipeline_mode<synchronous>, transform_indices = @transform_6, window_bounds = array<i64: 8, 128, 128>}, {pipeline_mode = #tpu.pipeline_mode<synchronous>, transform_indices = @transform_7, window_bounds = array<i64: 16, 128>}, {pipeline_mode = #tpu.pipeline_mode<synchronous>, transform_indices = @transform_8, window_bounds = array<i64: 8, 128>}]} {
    %c0 = arith.constant 0 : index
    %c0_0 = arith.constant 0 : index
    %0 = vector.load %arg1[%c0, %c0_0] : memref<128x128xf32, #tpu.memory_space<vmem>>, vector<128x128xf32>
    %c0_1 = arith.constant 0 : index
    %c0_2 = arith.constant 0 : index
    %1 = vector.load %arg2[%c0_1, %c0_2] : memref<128x128xbf16, #tpu.memory_space<vmem>>, vector<128x128xbf16>
    %2 = arith.truncf %0 : vector<128x128xf32> to vector<128x128xbf16>
    %cst = arith.constant dense<0.000000e+00> : vector<128x128xf32>
    %3 = tpu.matmul %1, %2, %cst {dimension_numbers = #tpu.dot_dimension_numbers<[1], [0], [0], [1], [0, 0, 1, 1], [], []>} : vector<128x128xbf16>, vector<128x128xbf16>, vector<128x128xf32> -> vector<128x128xf32>
    %c0_3 = arith.constant 0 : index
    %c0_4 = arith.constant 0 : index
    %4 = vector.load %arg8[%c0_3, %c0_4] : memref<16x128xf32, #tpu.memory_space<vmem>>, vector<1x128xf32>
    %5 = vector.broadcast %4 : vector<1x128xf32> to vector<128x128xf32>
    %6 = arith.mulf %5, %0 : vector<128x128xf32>
    %7 = arith.addf %3, %6 : vector<128x128xf32>
    %8 = arith.truncf %7 : vector<128x128xf32> to vector<128x128xbf16>
    %c0_5 = arith.constant 0 : index
    %c0_6 = arith.constant 0 : index
    %c0_7 = arith.constant 0 : index
    %9 = vector.load %arg7[%c0_5, %c0_6, %c0_7] : memref<8x128x128xbf16, #tpu.memory_space<vmem>>, vector<1x128x128xbf16>
    %10 = vector.shape_cast %9 : vector<1x128x128xbf16> to vector<128x128xbf16>
    %cst_8 = arith.constant dense<0.000000e+00> : vector<128x128xf32>
    %11 = tpu.matmul %8, %10, %cst_8 {dimension_numbers = #tpu.dot_dimension_numbers<[1], [0], [0], [1], [0, 0, 1, 1], [], []>} : vector<128x128xbf16>, vector<128x128xbf16>, vector<128x128xf32> -> vector<128x128xf32>
    %c1 = arith.constant 1 : index
    %c0_9 = arith.constant 0 : index
    %12 = vector.load %arg8[%c1, %c0_9] : memref<16x128xf32, #tpu.memory_space<vmem>>, vector<1x128xf32>
    %13 = vector.broadcast %12 : vector<1x128xf32> to vector<128x128xf32>
    %14 = arith.mulf %11, %13 : vector<128x128xf32>
    %c2 = arith.constant 2 : index
    %c0_10 = arith.constant 0 : index
    %15 = vector.load %arg8[%c2, %c0_10] : memref<16x128xf32, #tpu.memory_space<vmem>>, vector<1x128xf32>
    %16 = vector.broadcast %15 : vector<1x128xf32> to vector<128x128xf32>
    %17 = arith.addf %14, %16 : vector<128x128xf32>
    %cst_11 = arith.constant 0.000000e+00 : f32
    %18 = vector.broadcast %cst_11 : f32 to vector<128x128xf32>
    %19 = arith.maximumf %17, %18 : vector<128x128xf32>
    %20 = arith.truncf %19 : vector<128x128xf32> to vector<128x128xbf16>
    %c2_12 = arith.constant 2 : index
    %c0_13 = arith.constant 0 : index
    %c0_14 = arith.constant 0 : index
    %21 = vector.load %arg7[%c2_12, %c0_13, %c0_14] : memref<8x128x128xbf16, #tpu.memory_space<vmem>>, vector<1x128x128xbf16>
    %22 = vector.shape_cast %21 : vector<1x128x128xbf16> to vector<128x128xbf16>
    %cst_15 = arith.constant dense<0.000000e+00> : vector<128x128xf32>
    %23 = tpu.matmul %20, %22, %cst_15 {dimension_numbers = #tpu.dot_dimension_numbers<[1], [0], [0], [1], [0, 0, 1, 1], [], []>} : vector<128x128xbf16>, vector<128x128xbf16>, vector<128x128xf32> -> vector<128x128xf32>
    %c3 = arith.constant 3 : index
    %c0_16 = arith.constant 0 : index
    %24 = vector.load %arg8[%c3, %c0_16] : memref<16x128xf32, #tpu.memory_space<vmem>>, vector<1x128xf32>
    %25 = vector.broadcast %24 : vector<1x128xf32> to vector<128x128xf32>
    %26 = arith.mulf %23, %25 : vector<128x128xf32>
    %c4 = arith.constant 4 : index
    %c0_17 = arith.constant 0 : index
    %27 = vector.load %arg8[%c4, %c0_17] : memref<16x128xf32, #tpu.memory_space<vmem>>, vector<1x128xf32>
    %28 = vector.broadcast %27 : vector<1x128xf32> to vector<128x128xf32>
    %29 = arith.addf %26, %28 : vector<128x128xf32>
    %cst_18 = arith.constant 0.000000e+00 : f32
    %30 = vector.broadcast %cst_18 : f32 to vector<128x128xf32>
    %31 = arith.maximumf %29, %30 : vector<128x128xf32>
    %32 = arith.truncf %31 : vector<128x128xf32> to vector<128x128xbf16>
    %cst_19 = arith.constant dense<0.000000e+00> : vector<128x128xf32>
    %33 = tpu.matmul %1, %32, %cst_19 {dimension_numbers = #tpu.dot_dimension_numbers<[1], [0], [0], [1], [0, 0, 1, 1], [], []>} : vector<128x128xbf16>, vector<128x128xbf16>, vector<128x128xf32> -> vector<128x128xf32>
    %c5 = arith.constant 5 : index
    %c0_20 = arith.constant 0 : index
    %34 = vector.load %arg8[%c5, %c0_20] : memref<16x128xf32, #tpu.memory_space<vmem>>, vector<1x128xf32>
    %35 = vector.broadcast %34 : vector<1x128xf32> to vector<128x128xf32>
    %36 = arith.mulf %35, %31 : vector<128x128xf32>
    %37 = arith.addf %33, %36 : vector<128x128xf32>
    %38 = arith.truncf %37 : vector<128x128xf32> to vector<128x128xbf16>
    %c1_21 = arith.constant 1 : index
    %c0_22 = arith.constant 0 : index
    %c0_23 = arith.constant 0 : index
    %39 = vector.load %arg7[%c1_21, %c0_22, %c0_23] : memref<8x128x128xbf16, #tpu.memory_space<vmem>>, vector<1x128x128xbf16>
    %40 = vector.shape_cast %39 : vector<1x128x128xbf16> to vector<128x128xbf16>
    %cst_24 = arith.constant dense<0.000000e+00> : vector<128x128xf32>
    %41 = tpu.matmul %38, %40, %cst_24 {dimension_numbers = #tpu.dot_dimension_numbers<[1], [0], [0], [1], [0, 0, 1, 1], [], []>} : vector<128x128xbf16>, vector<128x128xbf16>, vector<128x128xf32> -> vector<128x128xf32>
    %c6 = arith.constant 6 : index
    %c0_25 = arith.constant 0 : index
    %42 = vector.load %arg8[%c6, %c0_25] : memref<16x128xf32, #tpu.memory_space<vmem>>, vector<1x128xf32>
    %43 = vector.broadcast %42 : vector<1x128xf32> to vector<128x128xf32>
    %44 = arith.mulf %41, %43 : vector<128x128xf32>
    %c7 = arith.constant 7 : index
    %c0_26 = arith.constant 0 : index
    %45 = vector.load %arg8[%c7, %c0_26] : memref<16x128xf32, #tpu.memory_space<vmem>>, vector<1x128xf32>
    %46 = vector.broadcast %45 : vector<1x128xf32> to vector<128x128xf32>
    %47 = arith.addf %44, %46 : vector<128x128xf32>
    %cst_27 = arith.constant 0.000000e+00 : f32
    %48 = vector.broadcast %cst_27 : f32 to vector<128x128xf32>
    %49 = arith.maximumf %47, %48 : vector<128x128xf32>
    %50 = arith.truncf %49 : vector<128x128xf32> to vector<128x128xbf16>
    %c3_28 = arith.constant 3 : index
    %c0_29 = arith.constant 0 : index
    %c0_30 = arith.constant 0 : index
    %51 = vector.load %arg7[%c3_28, %c0_29, %c0_30] : memref<8x128x128xbf16, #tpu.memory_space<vmem>>, vector<1x128x128xbf16>
    %52 = vector.shape_cast %51 : vector<1x128x128xbf16> to vector<128x128xbf16>
    %cst_31 = arith.constant dense<0.000000e+00> : vector<128x128xf32>
    %53 = tpu.matmul %50, %52, %cst_31 {dimension_numbers = #tpu.dot_dimension_numbers<[1], [0], [0], [1], [0, 0, 1, 1], [], []>} : vector<128x128xbf16>, vector<128x128xbf16>, vector<128x128xf32> -> vector<128x128xf32>
    %c8 = arith.constant 8 : index
    %c0_32 = arith.constant 0 : index
    %54 = vector.load %arg8[%c8, %c0_32] : memref<16x128xf32, #tpu.memory_space<vmem>>, vector<1x128xf32>
    %55 = vector.broadcast %54 : vector<1x128xf32> to vector<128x128xf32>
    %56 = arith.mulf %53, %55 : vector<128x128xf32>
    %c9 = arith.constant 9 : index
    %c0_33 = arith.constant 0 : index
    %57 = vector.load %arg8[%c9, %c0_33] : memref<16x128xf32, #tpu.memory_space<vmem>>, vector<1x128xf32>
    %58 = vector.broadcast %57 : vector<1x128xf32> to vector<128x128xf32>
    %59 = arith.addf %56, %58 : vector<128x128xf32>
    %cst_34 = arith.constant 0.000000e+00 : f32
    %60 = vector.broadcast %cst_34 : f32 to vector<128x128xf32>
    %61 = arith.maximumf %59, %60 : vector<128x128xf32>
    %c0_35 = arith.constant 0 : index
    %c0_36 = arith.constant 0 : index
    %62 = vector.load %arg3[%c0_35, %c0_36] : memref<128x128xf32, #tpu.memory_space<vmem>>, vector<128x128xf32>
    %c0_37 = arith.constant 0 : index
    %c0_38 = arith.constant 0 : index
    %63 = vector.load %arg4[%c0_37, %c0_38] : memref<128x128xbf16, #tpu.memory_space<vmem>>, vector<128x128xbf16>
    %64 = arith.truncf %62 : vector<128x128xf32> to vector<128x128xbf16>
    %c4_39 = arith.constant 4 : index
    %c0_40 = arith.constant 0 : index
    %c0_41 = arith.constant 0 : index
    %65 = vector.load %arg7[%c4_39, %c0_40, %c0_41] : memref<8x128x128xbf16, #tpu.memory_space<vmem>>, vector<1x128x128xbf16>
    %66 = vector.shape_cast %65 : vector<1x128x128xbf16> to vector<128x128xbf16>
    %cst_42 = arith.constant dense<0.000000e+00> : vector<128x128xf32>
    %67 = tpu.matmul %64, %66, %cst_42 {dimension_numbers = #tpu.dot_dimension_numbers<[1], [0], [0], [1], [0, 0, 1, 1], [], []>} : vector<128x128xbf16>, vector<128x128xbf16>, vector<128x128xf32> -> vector<128x128xf32>
    %68 = arith.truncf %67 : vector<128x128xf32> to vector<128x128xbf16>
    %cst_43 = arith.constant dense<0.000000e+00> : vector<128x128xf32>
    %69 = tpu.matmul %63, %68, %cst_43 {dimension_numbers = #tpu.dot_dimension_numbers<[1], [0], [0], [1], [0, 0, 1, 1], [], []>} : vector<128x128xbf16>, vector<128x128xbf16>, vector<128x128xf32> -> vector<128x128xf32>
    %c10 = arith.constant 10 : index
    %c0_44 = arith.constant 0 : index
    %70 = vector.load %arg8[%c10, %c0_44] : memref<16x128xf32, #tpu.memory_space<vmem>>, vector<1x128xf32>
    %71 = vector.broadcast %70 : vector<1x128xf32> to vector<128x128xf32>
    %72 = arith.mulf %69, %71 : vector<128x128xf32>
    %c11 = arith.constant 11 : index
    %c0_45 = arith.constant 0 : index
    %73 = vector.load %arg8[%c11, %c0_45] : memref<16x128xf32, #tpu.memory_space<vmem>>, vector<1x128xf32>
    %74 = vector.broadcast %73 : vector<1x128xf32> to vector<128x128xf32>
    %75 = arith.addf %72, %74 : vector<128x128xf32>
    %cst_46 = arith.constant 0.000000e+00 : f32
    %76 = vector.broadcast %cst_46 : f32 to vector<128x128xf32>
    %77 = arith.maximumf %75, %76 : vector<128x128xf32>
    %78 = arith.truncf %77 : vector<128x128xf32> to vector<128x128xbf16>
    %c5_47 = arith.constant 5 : index
    %c0_48 = arith.constant 0 : index
    %c0_49 = arith.constant 0 : index
    %79 = vector.load %arg7[%c5_47, %c0_48, %c0_49] : memref<8x128x128xbf16, #tpu.memory_space<vmem>>, vector<1x128x128xbf16>
    %80 = vector.shape_cast %79 : vector<1x128x128xbf16> to vector<128x128xbf16>
    %cst_50 = arith.constant dense<0.000000e+00> : vector<128x128xf32>
    %81 = tpu.matmul %78, %80, %cst_50 {dimension_numbers = #tpu.dot_dimension_numbers<[1], [0], [0], [1], [0, 0, 1, 1], [], []>} : vector<128x128xbf16>, vector<128x128xbf16>, vector<128x128xf32> -> vector<128x128xf32>
    %82 = arith.truncf %81 : vector<128x128xf32> to vector<128x128xbf16>
    %cst_51 = arith.constant dense<0.000000e+00> : vector<128x128xf32>
    %83 = tpu.matmul %63, %82, %cst_51 {dimension_numbers = #tpu.dot_dimension_numbers<[1], [0], [0], [1], [0, 0, 1, 1], [], []>} : vector<128x128xbf16>, vector<128x128xbf16>, vector<128x128xf32> -> vector<128x128xf32>
    %c12 = arith.constant 12 : index
    %c0_52 = arith.constant 0 : index
    %84 = vector.load %arg8[%c12, %c0_52] : memref<16x128xf32, #tpu.memory_space<vmem>>, vector<1x128xf32>
    %85 = vector.broadcast %84 : vector<1x128xf32> to vector<128x128xf32>
    %86 = arith.mulf %83, %85 : vector<128x128xf32>
    %c13 = arith.constant 13 : index
    %c0_53 = arith.constant 0 : index
    %87 = vector.load %arg8[%c13, %c0_53] : memref<16x128xf32, #tpu.memory_space<vmem>>, vector<1x128xf32>
    %88 = vector.broadcast %87 : vector<1x128xf32> to vector<128x128xf32>
    %89 = arith.addf %86, %88 : vector<128x128xf32>
    %cst_54 = arith.constant 0.000000e+00 : f32
    %90 = vector.broadcast %cst_54 : f32 to vector<128x128xf32>
    %91 = arith.maximumf %89, %90 : vector<128x128xf32>
    %92 = arith.truncf %61 : vector<128x128xf32> to vector<128x128xbf16>
    %c6_55 = arith.constant 6 : index
    %c0_56 = arith.constant 0 : index
    %c0_57 = arith.constant 0 : index
    %93 = vector.load %arg7[%c6_55, %c0_56, %c0_57] : memref<8x128x128xbf16, #tpu.memory_space<vmem>>, vector<1x128x128xbf16>
    %94 = vector.shape_cast %93 : vector<1x128x128xbf16> to vector<128x128xbf16>
    %cst_58 = arith.constant dense<0.000000e+00> : vector<128x128xf32>
    %95 = tpu.matmul %92, %94, %cst_58 {dimension_numbers = #tpu.dot_dimension_numbers<[1], [0], [0], [1], [0, 0, 1, 1], [], []>} : vector<128x128xbf16>, vector<128x128xbf16>, vector<128x128xf32> -> vector<128x128xf32>
    %c14 = arith.constant 14 : index
    %c0_59 = arith.constant 0 : index
    %96 = vector.load %arg8[%c14, %c0_59] : memref<16x128xf32, #tpu.memory_space<vmem>>, vector<1x128xf32>
    %97 = vector.broadcast %96 : vector<1x128xf32> to vector<128x128xf32>
    %98 = arith.addf %95, %97 : vector<128x128xf32>
    %99 = arith.truncf %91 : vector<128x128xf32> to vector<128x128xbf16>
    %c7_60 = arith.constant 7 : index
    %c0_61 = arith.constant 0 : index
    %c0_62 = arith.constant 0 : index
    %100 = vector.load %arg7[%c7_60, %c0_61, %c0_62] : memref<8x128x128xbf16, #tpu.memory_space<vmem>>, vector<1x128x128xbf16>
    %101 = vector.shape_cast %100 : vector<1x128x128xbf16> to vector<128x128xbf16>
    %cst_63 = arith.constant dense<0.000000e+00> : vector<128x128xf32>
    %102 = tpu.matmul %99, %101, %cst_63 {dimension_numbers = #tpu.dot_dimension_numbers<[1], [0], [0], [1], [0, 0, 1, 1], [], []>} : vector<128x128xbf16>, vector<128x128xbf16>, vector<128x128xf32> -> vector<128x128xf32>
    %c15 = arith.constant 15 : index
    %c0_64 = arith.constant 0 : index
    %103 = vector.load %arg8[%c15, %c0_64] : memref<16x128xf32, #tpu.memory_space<vmem>>, vector<1x128xf32>
    %104 = vector.broadcast %103 : vector<1x128xf32> to vector<128x128xf32>
    %105 = arith.addf %102, %104 : vector<128x128xf32>
    %c0_65 = arith.constant 0 : index
    %c0_66 = arith.constant 0 : index
    %106 = vector.load %arg5[%c0_65, %c0_66] : memref<8x128xbf16, #tpu.memory_space<vmem>>, vector<8x128xbf16>
    %107 = arith.truncf %98 : vector<128x128xf32> to vector<128x128xbf16>
    %cst_67 = arith.constant dense<0.000000e+00> : vector<8x128xf32>
    %108 = tpu.matmul %106, %107, %cst_67 {dimension_numbers = #tpu.dot_dimension_numbers<[1], [0], [0], [1], [0, 0, 1, 1], [], []>} : vector<8x128xbf16>, vector<128x128xbf16>, vector<8x128xf32> -> vector<8x128xf32>
    %c0_68 = arith.constant 0 : index
    %c0_69 = arith.constant 0 : index
    %109 = vector.load %arg6[%c0_68, %c0_69] : memref<128x128xbf16, #tpu.memory_space<vmem>>, vector<128x128xbf16>
    %110 = arith.truncf %105 : vector<128x128xf32> to vector<128x128xbf16>
    %cst_70 = arith.constant dense<0.000000e+00> : vector<128x128xf32>
    %111 = tpu.matmul %109, %110, %cst_70 {dimension_numbers = #tpu.dot_dimension_numbers<[1], [0], [0], [1], [0, 0, 1, 1], [], []>} : vector<128x128xbf16>, vector<128x128xbf16>, vector<128x128xf32> -> vector<128x128xf32>
    %112 = arith.truncf %108 : vector<8x128xf32> to vector<8x128xbf16>
    %113 = arith.truncf %111 : vector<128x128xf32> to vector<128x128xbf16>
    %cst_71 = arith.constant dense<0.000000e+00> : vector<8x128xf32>
    %114 = tpu.matmul %112, %113, %cst_71 {dimension_numbers = #tpu.dot_dimension_numbers<[1], [1], [0], [0], [0, 0, 1, 0], [], []>} : vector<8x128xbf16>, vector<128x128xbf16>, vector<8x128xf32> -> vector<8x128xf32>
    %115 = arith.negf %114 : vector<8x128xf32>
    %116 = math.exp %115 : vector<8x128xf32>
    %cst_72 = arith.constant 1.000000e+00 : f32
    %117 = vector.broadcast %cst_72 : f32 to vector<8x128xf32>
    %118 = arith.addf %117, %116 : vector<8x128xf32>
    %119 = arith.divf %117, %118 : vector<8x128xf32>
    %c0_73 = arith.constant 0 : index
    %c0_74 = arith.constant 0 : index
    %120 = vector.load %arg9[%c0_73, %c0_74] : memref<8x128xf32, #tpu.memory_space<vmem>>, vector<8x128xf32>
    tpu.vector_store %arg9[%c0_73, %c0_74], %119 {strides = array<i32>} : memref<8x128xf32, #tpu.memory_space<vmem>>, vector<8x128xf32>,
    return
  }
  func.func @transform_0(%arg0: i32) -> (i32, i32) {
    %c0_i32 = arith.constant 0 : i32
    %c0_i32_0 = arith.constant 0 : i32
    %c0_i32_1 = arith.constant 0 : i32
    return %c0_i32, %c0_i32_0 : i32, i32
  }
  func.func @transform_1(%arg0: i32) -> (i32, i32) {
    %c0_i32 = arith.constant 0 : i32
    %c0_i32_0 = arith.constant 0 : i32
    %c0_i32_1 = arith.constant 0 : i32
    return %c0_i32, %c0_i32_0 : i32, i32
  }
  func.func @transform_2(%arg0: i32) -> (i32, i32) {
    %c0_i32 = arith.constant 0 : i32
    %c0_i32_0 = arith.constant 0 : i32
    %c0_i32_1 = arith.constant 0 : i32
    return %c0_i32, %c0_i32_0 : i32, i32
  }
  func.func @transform_3(%arg0: i32) -> (i32, i32) {
    %c0_i32 = arith.constant 0 : i32
    %c0_i32_0 = arith.constant 0 : i32
    %c0_i32_1 = arith.constant 0 : i32
    return %c0_i32, %c0_i32_0 : i32, i32
  }
  func.func @transform_4(%arg0: i32) -> (i32, i32) {
    %c0_i32 = arith.constant 0 : i32
    %c0_i32_0 = arith.constant 0 : i32
    %c0_i32_1 = arith.constant 0 : i32
    return %c0_i32, %c0_i32_0 : i32, i32
  }
  func.func @transform_5(%arg0: i32) -> (i32, i32) {
    %c0_i32 = arith.constant 0 : i32
    %c0_i32_0 = arith.constant 0 : i32
    %c0_i32_1 = arith.constant 0 : i32
    return %c0_i32, %c0_i32_0 : i32, i32
  }
  func.func @transform_6(%arg0: i32) -> (i32, i32, i32) {
    %c0_i32 = arith.constant 0 : i32
    %c0_i32_0 = arith.constant 0 : i32
    %c0_i32_1 = arith.constant 0 : i32
    %c0_i32_2 = arith.constant 0 : i32
    return %c0_i32, %c0_i32_0, %c0_i32_1 : i32, i32, i32
  }
  func.func @transform_7(%arg0: i32) -> (i32, i32) {
    %c0_i32 = arith.constant 0 : i32
    %c0_i32_0 = arith.constant 0 : i32
    %c0_i32_1 = arith.constant 0 : i32
    return %c0_i32, %c0_i32_0 : i32, i32
  }
  func.func @transform_8(%arg0: i32) -> (i32, i32) {
    %c0_i32 = arith.constant 0 : i32
    %c0_i32_0 = arith.constant 0 : i32
    %c0_i32_1 = arith.constant 0 : i32
    return %c0_i32, %c0_i32_0 : i32, i32
  }
}

</mosaic_0001>

<bundles_post_ra>
// kernel: tpu_custom_call.1
= control target key start
LH: loop header
LB: loop body
LE: loop exit
PB: predicated region body
PF: predicated region fallthrough
CT: control target
= control target key end

     0   :  { %13 = vsyncpa [#allocation3], 0  ;;  %s3466_s0 = inlined_call_operand.hbm [shape: f32[128,128], index: 0, kind: input, shape index: {}]   ;;  %s3467_s1 = inlined_call_operand.hbm [shape: bf16[128,128], index: 1, kind: input, shape index: {}]   ;;  %s3468_s2 = inlined_call_operand.hbm [shape: f32[128,128], index: 2, kind: input, shape index: {}]   ;;  %s3469_s3 = inlined_call_operand.hbm [shape: bf16[128,128], index: 3, kind: input, shape index: {}]   ;;  %s3470_s4 = inlined_call_operand.hbm [shape: bf16[8,128], index: 4, kind: input, shape index: {}]   ;;  %s3471_s5 = inlined_call_operand.hbm [shape: bf16[128,128], index: 5, kind: input, shape index: {}]   ;;  %s3472_s6 = inlined_call_operand.hbm [shape: bf16[8,128,128], index: 6, kind: input, shape index: {}]   ;;  %s3473_s7 = inlined_call_operand.hbm [shape: f32[16,128], index: 7, kind: input, shape index: {}]   ;;  %s3474_s8 = inlined_call_operand.hbm [shape: f32[8,128], index: 8, kind: output, shape index: {}]  }
   0x1   :  { %14 = vsyncpa [#allocation6], 0 }
   0x2   :  { %15 = vsyncpa [#allocation9], 0 }
   0x3   :  { %16 = vsyncpa [#allocation12], 0 }
   0x4   :  { %17 = vsyncpa [#allocation15], 0  ;;  %s36_s29 = sshll.u32 %s3467_s1, 4  ;;  %s37_s29 = int_to_ptr.hbm [resolvable:$true] %s36_s29 }
   0x5   :  { %18 = vsyncpa [#allocation4], 0  ;;  %s2792_s30 = smov [#allocation5]   ;;  %s62_s12 = sshll.u32 %s3469_s3, 4  ;;  %s63_s12 = int_to_ptr.hbm [resolvable:$true] %s62_s12 }
   0x6   :  { %s38_s9 = sshll.u32 %s2792_s30, 4  ;;  %s2793_s13 = smov 64   ;;  %s39_s9 = int_to_ptr.vmem [resolvable:$true] %s38_s9 }
   0x7   :  { %s2794_s14 = smov 4   ;;  %s2795_s15 = smov [#allocation8]  }
   0x8   :  { %44 = dma.hbm_to_vmem [thread:$0]  %s37_s29, 1024, %s39_s9, [#allocation6], %s2793_s13, %s2793_s13, %s2794_s14  }
   0x9   :  { %s64_s16 = sshll.u32 %s2795_s15, 4  ;;  %s86_s18 = sshll.u32 %s3471_s5, 4  ;;  %s65_s16 = int_to_ptr.vmem [resolvable:$true] %s64_s16  ;;  %s87_s18 = int_to_ptr.hbm [resolvable:$true] %s86_s18 }
   0xa   :  { %70 = dma.hbm_to_vmem [thread:$0]  %s63_s12, 1024, %s65_s16, [#allocation9], %s2793_s13, %s2793_s13, %s2794_s14  }
   0xb   :  { %s23_s20 = sshll.u32 %s3466_s0, 4  ;;  %s2796_s21 = smov [#allocation11]   ;;  %s24_s20 = int_to_ptr.hbm [resolvable:$true] %s23_s20 }
   0xc   :  { %s88_s22 = sshll.u32 %s2796_s21, 4  ;;  %s2797_s23 = smov [#allocation2]   ;;  %s89_s22 = int_to_ptr.vmem [resolvable:$true] %s88_s22 }
   0xd   :  { %94 = dma.hbm_to_vmem [thread:$0]  %s87_s18, 1024, %s89_s22, [#allocation12], %s2793_s13, %s2793_s13, %s2794_s14  }
   0xe   :  { %s25_s5 = sshll.u32 %s2797_s23, 4  ;;  %s2798_s24 = smov 128   ;;  %s26_s5 = int_to_ptr.vmem [resolvable:$true] %s25_s5 }
   0xf   :  { %s2799_s25 = smov 8   ;;  %s49_s28 = sshll.u32 %s3468_s2, 4  ;;  %s50_s28 = int_to_ptr.hbm [resolvable:$true] %s49_s28 }
  0x10   :  { %31 = dma.hbm_to_vmem [thread:$0]  %s24_s20, 2048, %s26_s5, [#allocation3], %s2798_s24, %s2798_s24, %s2799_s25  }
  0x11   :  { %s2800_s0 = smov [#allocation7]   ;;  %s76_s10 = sshll.u32 %s3470_s4, 4  ;;  %s77_s10 = int_to_ptr.hbm [resolvable:$true] %s76_s10 }
  0x12   :  { %s51_s29 = sshll.u32 %s2800_s0, 4  ;;  %s2801_s11 = smov [#allocation10]   ;;  %s52_s29 = int_to_ptr.vmem [resolvable:$true] %s51_s29 }
  0x13   :  { %57 = dma.hbm_to_vmem [thread:$0]  %s50_s28, 2048, %s52_s29, [#allocation6], %s2798_s24, %s2798_s24, %s2799_s25  }
  0x14   :  { %s78_s12 = sshll.u32 %s2801_s11, 4  ;;  %s99_s17 = sshll.u32 %s3472_s6, 4  ;;  %s79_s12 = int_to_ptr.vmem [resolvable:$true] %s78_s12  ;;  %s100_s17 = int_to_ptr.hbm [resolvable:$true] %s99_s17 }
  0x15   :  { %81 = dma.hbm_to_vmem [thread:$0]  %s77_s10, 64, %s79_s12, [#allocation9]  }
  0x16   :  { %s112_s18 = sshll.u32 %s3473_s7, 4  ;;  %s2802_s3 = smov [#allocation13]   ;;  %s113_s18 = int_to_ptr.hbm [resolvable:$true] %s112_s18 }
  0x17   :  { %s101_s19 = sshll.u32 %s2802_s3, 4  ;;  %s2803_s4 = smov [#allocation14]   ;;  %s102_s19 = int_to_ptr.vmem [resolvable:$true] %s101_s19 }
  0x18   :  { %107 = dma.hbm_to_vmem [thread:$0]  %s100_s17, 8192, %s102_s19, [#allocation12], %s2793_s13, %s2793_s13, %s2794_s14  }
  0x19   :  { %s114_s20 = sshll.u32 %s2803_s4, 4  ;;  %s115_s20 = int_to_ptr.vmem [resolvable:$true] %s114_s20 }
  0x1a   :  { %120 = dma.hbm_to_vmem [thread:$0]  %s113_s18, 256, %s115_s20, [#allocation15], %s2798_s24, %s2798_s24, %s2799_s25  }
  0x1b   :  { %2780 = dma.done.wait [#allocation3], 2048  }
  0x1c   :  { %2781 = vsyncadd [#allocation3], 4294965248 }
  0x1d   :  { %2782 = dma.done.wait [#allocation6], 3072  }
  0x1e   :  { %2783 = vsyncadd [#allocation6], 4294964224 }
  0x1f   :  { %2784 = dma.done.wait [#allocation9], 1088  }
  0x20   :  { %2785 = vsyncadd [#allocation9], 4294966208 }
  0x21   :  { %2786 = dma.done.wait [#allocation12], 9216  }
  0x22   :  { %2787 = vsyncadd [#allocation12], 4294958080 }
  0x23   :  { %2788 = dma.done.wait [#allocation15], 256  }
  0x24   :  { %2789 = vsyncadd [#allocation15], 4294967040  ;;  %v2886_v0 = vld [vmem:[#allocation2 + $0x70] sm:$0xff]  ;;  %v2888_v1 = vld [vmem:[#allocation2 + $0x78] sm:$0xff]  ;;  %s2804_s6 = smov [#allocation16]   ;;  %s2060_s21 = sshll.u32 %s3474_s8, 4  ;;  %s2061_s21 = int_to_ptr.hbm [resolvable:$true] %s2060_s21 }
  0x25   :  { %v192_v2 = vpack.c.bf16 %v2888_v1, %v2886_v0  ;;  %v2892_v3 = vld [vmem:[#allocation2 + $0x60] sm:$0xff]  ;;  %v2894_v4 = vld [vmem:[#allocation2 + $0x68] sm:$0xff]  ;;  %v2898_v6 = vld [vmem:[#allocation2 + $0x50] sm:$0xff]  ;;  %s2058_s7 = sshll.u32 %s2804_s6, 4  ;;  %s2059_s7 = int_to_ptr.vmem [resolvable:$true] %s2058_s7 }
  0x26   :  { %v191_v5 = vpack.c.bf16 %v2894_v4, %v2892_v3  ;;  %v2900_v7 = vld [vmem:[#allocation2 + $0x58] sm:$0xff]  ;;  %v2902_v8 = vld [vmem:[#allocation2 + $0x40] sm:$0xff]  ;;  %v2904_v9 = vld [vmem:[#allocation2 + $0x48] sm:$0xff] }
  0x27   :  { %259 = vmatpush.bf16.msra.mxu0 %v192_v2  ;;  %v190_v10 = vpack.c.bf16 %v2900_v7, %v2898_v6  ;;  %v189_v11 = vpack.c.bf16 %v2904_v9, %v2902_v8  ;;  %v2910_v12 = vld [vmem:[#allocation2 + $0x30] sm:$0xff]  ;;  %v2912_v13 = vld [vmem:[#allocation2 + $0x38] sm:$0xff]  ;;  %v2916_v15 = vld [vmem:[#allocation2 + $0x20] sm:$0xff] }
  0x28   :  { %v188_v14 = vpack.c.bf16 %v2912_v13, %v2910_v12  ;;  %v2918_v16 = vld [vmem:[#allocation2 + $0x28] sm:$0xff]  ;;  %v2922_v18 = vld [vmem:[#allocation2 + $0x10] sm:$0xff]  ;;  %v2924_v19 = vld [vmem:[#allocation2 + $0x18] sm:$0xff] }
  0x29   :  { %v187_v17 = vpack.c.bf16 %v2918_v16, %v2916_v15  ;;  %v186_v20 = vpack.c.bf16 %v2924_v19, %v2922_v18  ;;  %v153_v21 = vld [vmem:[#allocation2] sm:$0xff]  ;;  %v154_v22 = vld [vmem:[#allocation2 + $0x8] sm:$0xff]  ;;  %v2934_v26 = vld [vmem:[#allocation5 + $0x10] sm:$0xff] }
  0x2a   :  { %v185_v23 = vpack.c.bf16 %v154_v22, %v153_v21  ;;  %v2928_v24 = vld [vmem:[#allocation5] sm:$0xff]  ;;  %v2931_v25 = vld [vmem:[#allocation5 + $0x8] sm:$0xff]  ;;  %v2937_v27 = vld [vmem:[#allocation5 + $0x18] sm:$0xff] }
  0x2b   :  { %260 = vmatpush.bf16.msra.mxu0 %v191_v5  ;;  %v2940_v28 = vld [vmem:[#allocation5 + $0x20] sm:$0xff]  ;;  %v2441_v30 = vld [vmem:[#allocation13 + $0x30] sm:$0xff]  ;;  %v2943_v31 = vld [vmem:[#allocation5 + $0x28] sm:$0xff] }
  0x2c   :  { %v2442_v29 = vld [vmem:[#allocation13 + $0x38] sm:$0xff]  ;;  %v2440_v32 = vld [vmem:[#allocation13 + $0x28] sm:$0xff]  ;;  %v2439_v33 = vld [vmem:[#allocation13 + $0x20] sm:$0xff] }
  0x2d   :  { %2515 = vmatpush.bf16.msra.mxu1 %v2442_v29  ;;  %2516 = vmatpush.bf16.msra.mxu3 %v2442_v29  ;;  %v2438_v34 = vld [vmem:[#allocation13 + $0x18] sm:$0xff]  ;;  %v2946_v35 = vld [vmem:[#allocation5 + $0x30] sm:$0xff]  ;;  %v2435_v38 = vld [vmem:[#allocation13] sm:$0xff] }
  0x2e   :  { %v2437_v36 = vld [vmem:[#allocation13 + $0x10] sm:$0xff]  ;;  %v2436_v37 = vld [vmem:[#allocation13 + $0x8] sm:$0xff]  ;;  %v2952_v41 = vld [vmem:[#allocation14] ss:$0 sm:$0xff] }
  0x2f   :  { %261 = vmatpush.bf16.msra.mxu0 %v190_v10  ;;  %v2949_v39 = vld [vmem:[#allocation5 + $0x38] sm:$0xff]  ;;  %v196_v42 = vmul.f32 %v2952_v41, %v154_v22  ;;  %v195_v43 = vmul.f32 %v2952_v41, %v153_v21  ;;  %v198_v49 = vmul.f32 %v2952_v41, %v2924_v19  ;;  %v197_v50 = vmul.f32 %v2952_v41, %v2922_v18 }
  0x30   :  { %v200_v56 = vmul.f32 %v2952_v41, %v2918_v16  ;;  %v199_v57 = vmul.f32 %v2952_v41, %v2916_v15  ;;  %v202_v63 = vmul.f32 %v2952_v41, %v2912_v13  ;;  %v201_v2 = vmul.f32 %v2952_v41, %v2910_v12 }
  0x31   :  { %2517 = vmatpush.bf16.msra.mxu1 %v2441_v30  ;;  %2518 = vmatpush.bf16.msra.mxu3 %v2441_v30  ;;  %v204_v15 = vmul.f32 %v2952_v41, %v2904_v9  ;;  %v206_v12 = vmul.f32 %v2952_v41, %v2900_v7  ;;  %v205_v22 = vmul.f32 %v2952_v41, %v2898_v6 }
  0x32   :  { %v207_v7 = vmul.f32 %v2952_v41, %v2892_v3  ;;  %v2443_v3 = vld [vmem:[#allocation13 + $0x80] sm:$0xff] }
  0x33   :  { %262 = vmatpush.bf16.msra.mxu0 %v189_v11 }
  0x35   :  { %2519 = vmatpush.bf16.msra.mxu1 %v2440_v32  ;;  %2520 = vmatpush.bf16.msra.mxu3 %v2440_v32 }
  0x37   :  { %263 = vmatpush.bf16.msra.mxu0 %v188_v14 }
  0x39   :  { %2521 = vmatpush.bf16.msra.mxu1 %v2439_v33  ;;  %2522 = vmatpush.bf16.msra.mxu3 %v2439_v33 }
  0x3b   :  { %264 = vmatpush.bf16.msra.mxu0 %v187_v17  ;;  %v203_v17 = vmul.f32 %v2952_v41, %v2902_v8  ;;  %v2449_v8 = vld [vmem:[#allocation13 + $0xb0] sm:$0xff] }
  0x3d   :  { %2523 = vmatpush.bf16.msra.mxu1 %v2438_v34  ;;  %2524 = vmatpush.bf16.msra.mxu3 %v2438_v34 }
  0x3f   :  { %265 = vmatpush.bf16.msra.mxu0 %v186_v20 }
  0x41   :  { %2525 = vmatpush.bf16.msra.mxu1 %v2437_v36  ;;  %2526 = vmatpush.bf16.msra.mxu3 %v2437_v36 }
  0x43   :  { %266 = vmatpush.bf16.msra.mxu0 %v185_v23 }
  0x45   :  { %2527 = vmatpush.bf16.msra.mxu1 %v2436_v37  ;;  %2528 = vmatpush.bf16.msra.mxu3 %v2436_v37 }
  0x46   :  { %267 = vmatmul.bf16.vlgmr.msra.gmra.mxu0 %v2928_v24 }
  0x47   :  { %380 = vmatpush.bf16.msrb.mxu0 %v2442_v29 }
  0x49   :  { %2529 = vmatpush.bf16.msra.mxu1 %v2435_v38  ;;  %2530 = vmatpush.bf16.msra.mxu3 %v2435_v38 }
  0x4b   :  { %381 = vmatpush.bf16.msrb.mxu0 %v2441_v30 }
  0x4f   :  { %382 = vmatpush.bf16.msrb.mxu0 %v2440_v32  ;;  %v2450_v32 = vld [vmem:[#allocation13 + $0xb8] sm:$0xff] }
  0x50   :  { %554 = vmatpush.bf16.msra.mxu2 %v2450_v32 }
  0x53   :  { %383 = vmatpush.bf16.msrb.mxu0 %v2439_v33  ;;  %v2448_v33 = vld [vmem:[#allocation13 + $0xa8] sm:$0xff] }
  0x54   :  { %555 = vmatpush.bf16.msra.mxu2 %v2449_v8 }
  0x56   :  { %272 = vmatmul.bf16.gmra.mxu0 %v2931_v25 }
  0x57   :  { %384 = vmatpush.bf16.msrb.mxu0 %v2438_v34 }
  0x58   :  { %556 = vmatpush.bf16.msra.mxu2 %v2448_v33 }
  0x5b   :  { %385 = vmatpush.bf16.msrb.mxu0 %v2437_v36  ;;  %v2447_v36 = vld [vmem:[#allocation13 + $0xa0] sm:$0xff] }
  0x5c   :  { %557 = vmatpush.bf16.msra.mxu2 %v2447_v36 }
  0x5f   :  { %386 = vmatpush.bf16.msrb.mxu0 %v2436_v37  ;;  %v208_v37 = vmul.f32 %v2952_v41, %v2894_v4  ;;  %v210_v4 = vmul.f32 %v2952_v41, %v2888_v1 }
  0x63   :  { %387 = vmatpush.bf16.msrb.mxu0 %v2435_v38 }
  0x66   :  { %277 = vmatmul.bf16.gmra.mxu0 %v2934_v26 }
  0x76   :  { %282 = vmatmul.bf16.gmra.mxu0 %v2937_v27 }
  0x86   :  { %287 = vmatmul.bf16.gmra.mxu0 %v2940_v28 }
  0x96   :  { %292 = vmatmul.bf16.gmra.mxu0 %v2943_v31 }
  0xa6   :  { %297 = vmatmul.bf16.gmra.mxu0 %v2946_v35 }
  0xb6   :  { %302 = vmatmul.bf16.gmra.mxu0 %v2949_v39 }
  0xc3   :  { %v268_v40 = vpop.f32.mrf.mxu0 }
  0xc4   :  { %v269_v45 = vadd.f32 %v268_v40, %v195_v43 }
  0xcb   :  { %v270_v44 = vpop.f32.mrf.mxu0 }
  0xcc   :  { %v271_v46 = vadd.f32 %v270_v44, %v196_v42  ;;  %v2446_v42 = vld [vmem:[#allocation13 + $0x98] sm:$0xff]  ;;  %v2445_v44 = vld [vmem:[#allocation13 + $0x90] sm:$0xff] }
  0xcd   :  { %558 = vmatpush.bf16.msra.mxu2 %v2446_v42 }
  0xce   :  { %v308_v47 = vpack.c.bf16 %v271_v46, %v269_v45  ;;  %v2444_v46 = vld [vmem:[#allocation13 + $0x88] sm:$0xff] }
  0xd0   :  { %388 = vmatmul.bf16.vlgmr.msrb.gmra.mxu0 %v308_v47  ;;  %v209_v47 = vmul.f32 %v2952_v41, %v2886_v0 }
  0xd1   :  { %559 = vmatpush.bf16.msra.mxu2 %v2445_v44 }
  0xd3   :  { %v273_v48 = vpop.f32.mrf.mxu0 }
  0xd4   :  { %v274_v52 = vadd.f32 %v273_v48, %v197_v50 }
  0xd5   :  { %560 = vmatpush.bf16.msra.mxu2 %v2444_v46  ;;  %v2482_v46 = vld [vmem:[#allocation13 + $0x138] sm:$0xff] }
  0xd9   :  { %561 = vmatpush.bf16.msra.mxu2 %v2443_v3 }
  0xdb   :  { %v275_v51 = vpop.f32.mrf.mxu0 }
  0xdc   :  { %v276_v53 = vadd.f32 %v275_v51, %v198_v49 }
  0xdd   :  { %1183 = vmatpush.bf16.msrb.mxu2 %v2482_v46 }
  0xde   :  { %v309_v54 = vpack.c.bf16 %v276_v53, %v274_v52  ;;  %v2984_v53 = vld [vmem:[#allocation14 + $0x1] ss:$0 sm:$0xff] }
  0xe0   :  { %393 = vmatmul.bf16.gmra.mxu0 %v309_v54 }
  0xe3   :  { %v278_v55 = vpop.f32.mrf.mxu0 }
  0xe4   :  { %v279_v59 = vadd.f32 %v278_v55, %v199_v57  ;;  %v2987_v55 = vld [vmem:[#allocation14 + $0x2] ss:$0 sm:$0xff] }
  0xeb   :  { %v280_v58 = vpop.f32.mrf.mxu0 }
  0xec   :  { %v281_v60 = vadd.f32 %v280_v58, %v200_v56 }
  0xee   :  { %v310_v61 = vpack.c.bf16 %v281_v60, %v279_v59 }
  0xf0   :  { %398 = vmatmul.bf16.vlgmr.msra.gmra.mxu1 %v310_v61 }
  0xf3   :  { %v283_v62 = vpop.f32.mrf.mxu0 }
  0xf4   :  { %v284_v10 = vadd.f32 %v283_v62, %v201_v2 }
  0xfb   :  { %v285_v5 = vpop.f32.mrf.mxu0 }
  0xfc   :  { %v286_v11 = vadd.f32 %v285_v5, %v202_v63 }
  0xfe   :  { %v311_v14 = vpack.c.bf16 %v286_v11, %v284_v10 }
 0x100   :  { %403 = vmatmul.bf16.gmra.mxu1 %v311_v14 }
 0x103   :  { %v288_v16 = vpop.f32.mrf.mxu0 }
 0x104   :  { %v289_v19 = vadd.f32 %v288_v16, %v203_v17 }
 0x10b   :  { %v290_v18 = vpop.f32.mrf.mxu0 }
 0x10c   :  { %v291_v20 = vadd.f32 %v290_v18, %v204_v15 }
 0x10e   :  { %v312_v21 = vpack.c.bf16 %v291_v20, %v289_v19 }
 0x110   :  { %408 = vmatmul.bf16.gmra.mxu1 %v312_v21 }
 0x113   :  { %v293_v13 = vpop.f32.mrf.mxu0 }
 0x114   :  { %v294_v29 = vadd.f32 %v293_v13, %v205_v22 }
 0x11b   :  { %v295_v23 = vpop.f32.mrf.mxu0 }
 0x11c   :  { %v296_v30 = vadd.f32 %v295_v23, %v206_v12 }
 0x11e   :  { %v313_v9 = vpack.c.bf16 %v296_v30, %v294_v29 }
 0x120   :  { %413 = vmatmul.bf16.vlgmr.msra.gmra.mxu3 %v313_v9 }
 0x123   :  { %v298_v34 = vpop.f32.mrf.mxu0 }
 0x124   :  { %v299_v38 = vadd.f32 %v298_v34, %v207_v7 }
 0x12b   :  { %v300_v6 = vpop.f32.mrf.mxu0 }
 0x12c   :  { %v301_v40 = vadd.f32 %v300_v6, %v208_v37 }
 0x12e   :  { %v314_v43 = vpack.c.bf16 %v301_v40, %v299_v38 }
 0x130   :  { %418 = vmatmul.bf16.gmra.mxu3 %v314_v43 }
 0x133   :  { %v303_v45 = vpop.f32.mrf.mxu0 }
 0x134   :  { %v304_v49 = vadd.f32 %v303_v45, %v209_v47  ;;  %v2481_v47 = vld [vmem:[#allocation13 + $0x130] sm:$0xff] }
 0x135   :  { %1184 = vmatpush.bf16.msrb.mxu2 %v2481_v47  ;;  %v1082_v47 = vld [vmem:[#allocation7 + $0x20] sm:$0xff] }
 0x13b   :  { %v305_v48 = vpop.f32.mrf.mxu0 }
 0x13c   :  { %v306_v50 = vadd.f32 %v305_v48, %v210_v4  ;;  %v2480_v48 = vld [vmem:[#allocation13 + $0x128] sm:$0xff] }
 0x13d   :  { %1185 = vmatpush.bf16.msrb.mxu2 %v2480_v48 }
 0x13e   :  { %v315_v51 = vpack.c.bf16 %v306_v50, %v304_v49 }
 0x140   :  { %423 = vmatmul.bf16.gmra.mxu3 %v315_v51 }
 0x14d   :  { %v389_v52 = vpop.f32.mrf.mxu0 }
 0x14e   :  { %v431_v54 = vmul.f32 %v2984_v53, %v389_v52  ;;  %v2479_v52 = vld [vmem:[#allocation13 + $0x120] sm:$0xff] }
 0x14f   :  { %1186 = vmatpush.bf16.msrb.mxu2 %v2479_v52 }
 0x150   :  { %v449_v0 = vadd.f32 %v2987_v55, %v431_v54 }
 0x152   :  { %v465_v41 = vmax.f32 %v449_v0, 0.0 }
 0x155   :  { %v391_v56 = vpop.f32.mrf.mxu0 }
 0x156   :  { %v432_v57 = vmul.f32 %v2984_v53, %v391_v56 }
 0x158   :  { %v450_v1 = vadd.f32 %v2987_v55, %v432_v57 }
 0x15a   :  { %v466_v58 = vmax.f32 %v450_v1, 0.0  ;;  %v2478_v1 = vld [vmem:[#allocation13 + $0x118] sm:$0xff] }
 0x15b   :  { %1187 = vmatpush.bf16.msrb.mxu2 %v2478_v1  ;;  %v1084_v1 = vld [vmem:[#allocation7 + $0x30] sm:$0xff] }
 0x15c   :  { %v481_v59 = vpack.c.bf16 %v466_v58, %v465_v41  ;;  %v2477_v41 = vld [vmem:[#allocation13 + $0x110] sm:$0xff] }
 0x15d   :  { %v394_v60 = vpop.f32.mrf.mxu0 }
 0x15e   :  { %562 = vmatmul.bf16.vlgmr.msra.gmra.mxu2 %v481_v59  ;;  %v433_v61 = vmul.f32 %v2984_v53, %v394_v60  ;;  %v2476_v59 = vld [vmem:[#allocation13 + $0x108] sm:$0xff] }
 0x15f   :  { %1188 = vmatpush.bf16.msrb.mxu2 %v2477_v41  ;;  %v1085_v41 = vld [vmem:[#allocation7 + $0x38] sm:$0xff] }
 0x160   :  { %v451_v63 = vadd.f32 %v2987_v55, %v433_v61 }
 0x162   :  { %v467_v10 = vmax.f32 %v451_v63, 0.0 }
 0x163   :  { %1189 = vmatpush.bf16.msrb.mxu2 %v2476_v59 }
 0x165   :  { %v396_v62 = vpop.f32.mrf.mxu0 }
 0x166   :  { %v434_v2 = vmul.f32 %v2984_v53, %v396_v62 }
 0x168   :  { %v452_v5 = vadd.f32 %v2987_v55, %v434_v2  ;;  %v2475_v2 = vld [vmem:[#allocation13 + $0x100] sm:$0xff] }
 0x169   :  { %1190 = vmatpush.bf16.msrb.mxu2 %v2475_v2 }
 0x16a   :  { %v468_v11 = vmax.f32 %v452_v5, 0.0 }
 0x16c   :  { %v482_v14 = vpack.c.bf16 %v468_v11, %v467_v10 }
 0x16d   :  { %v399_v16 = vpop.f32.mrf.mxu1 }
 0x16e   :  { %567 = vmatmul.bf16.gmra.mxu2 %v482_v14  ;;  %v435_v15 = vmul.f32 %v2984_v53, %v399_v16 }
 0x170   :  { %v453_v18 = vadd.f32 %v2987_v55, %v435_v15 }
 0x172   :  { %v469_v21 = vmax.f32 %v453_v18, 0.0 }
 0x175   :  { %v401_v17 = vpop.f32.mrf.mxu1 }
 0x176   :  { %v436_v19 = vmul.f32 %v2984_v53, %v401_v17 }
 0x178   :  { %v454_v20 = vadd.f32 %v2987_v55, %v436_v19 }
 0x17a   :  { %v470_v13 = vmax.f32 %v454_v20, 0.0 }
 0x17c   :  { %v483_v12 = vpack.c.bf16 %v470_v13, %v469_v21 }
 0x17d   :  { %v404_v22 = vpop.f32.mrf.mxu1 }
 0x17e   :  { %572 = vmatmul.bf16.gmra.mxu2 %v483_v12  ;;  %v437_v23 = vmul.f32 %v2984_v53, %v404_v22  ;;  %v1078_v12 = vld [vmem:[#allocation7] sm:$0xff]  ;;  %v1079_v22 = vld [vmem:[#allocation7 + $0x8] sm:$0xff] }
 0x180   :  { %v455_v30 = vadd.f32 %v2987_v55, %v437_v23  ;;  %v1110_v23 = vpack.c.bf16 %v1079_v22, %v1078_v12 }
 0x182   :  { %v471_v8 = vmax.f32 %v455_v30, 0.0  ;;  %v3020_v30 = vld [vmem:[#allocation14 + $0x3] ss:$0 sm:$0xff] }
 0x185   :  { %v406_v29 = vpop.f32.mrf.mxu1 }
 0x186   :  { %v438_v32 = vmul.f32 %v2984_v53, %v406_v29 }
 0x188   :  { %v456_v9 = vadd.f32 %v2987_v55, %v438_v32 }
 0x18a   :  { %v472_v33 = vmax.f32 %v456_v9, 0.0  ;;  %v3023_v9 = vld [vmem:[#allocation14 + $0x4] ss:$0 sm:$0xff] }
 0x18c   :  { %v484_v34 = vpack.c.bf16 %v472_v33, %v471_v8 }
 0x18d   :  { %v409_v36 = vpop.f32.mrf.mxu1 }
 0x18e   :  { %577 = vmatmul.bf16.gmra.mxu2 %v484_v34  ;;  %v439_v37 = vmul.f32 %v2984_v53, %v409_v36  ;;  %v1080_v34 = vld [vmem:[#allocation7 + $0x10] sm:$0xff]  ;;  %v1081_v36 = vld [vmem:[#allocation7 + $0x18] sm:$0xff] }
 0x190   :  { %v457_v6 = vadd.f32 %v2987_v55, %v439_v37 }
 0x192   :  { %v473_v42 = vmax.f32 %v457_v6, 0.0  ;;  %v1111_v6 = vpack.c.bf16 %v1081_v36, %v1080_v34  ;;  %v1092_v36 = vld [vmem:[#allocation7 + $0x70] sm:$0xff] }
 0x195   :  { %v411_v7 = vpop.f32.mrf.mxu1 }
 0x196   :  { %v440_v38 = vmul.f32 %v2984_v53, %v411_v7 }
 0x198   :  { %v458_v40 = vadd.f32 %v2987_v55, %v440_v38 }
 0x19a   :  { %v474_v43 = vmax.f32 %v458_v40, 0.0 }
 0x19c   :  { %v485_v44 = vpack.c.bf16 %v474_v43, %v473_v42 }
 0x19e   :  { %582 = vmatmul.bf16.gmra.mxu2 %v485_v44 }
 0x1a3   :  { %v414_v45 = vpop.f32.mrf.mxu3 }
 0x1a4   :  { %v441_v4 = vmul.f32 %v2984_v53, %v414_v45 }
 0x1a6   :  { %v459_v49 = vadd.f32 %v2987_v55, %v441_v4  ;;  %v1083_v4 = vld [vmem:[#allocation7 + $0x28] sm:$0xff] }
 0x1a8   :  { %v475_v54 = vmax.f32 %v459_v49, 0.0  ;;  %v1112_v49 = vpack.c.bf16 %v1083_v4, %v1082_v47 }
 0x1ab   :  { %v416_v3 = vpop.f32.mrf.mxu3 }
 0x1ac   :  { %v442_v50 = vmul.f32 %v2984_v53, %v416_v3 }
 0x1ae   :  { %v460_v51 = vadd.f32 %v2987_v55, %v442_v50 }
 0x1b0   :  { %v476_v56 = vmax.f32 %v460_v51, 0.0 }
 0x1b2   :  { %v486_v0 = vpack.c.bf16 %v476_v56, %v475_v54 }
 0x1b3   :  { %v419_v57 = vpop.f32.mrf.mxu3 }
 0x1b4   :  { %587 = vmatmul.bf16.gmra.mxu2 %v486_v0  ;;  %v443_v58 = vmul.f32 %v2984_v53, %v419_v57 }
 0x1b6   :  { %v461_v61 = vadd.f32 %v2987_v55, %v443_v58 }
 0x1b8   :  { %v477_v5 = vmax.f32 %v461_v61, 0.0 }
 0x1bb   :  { %v421_v60 = vpop.f32.mrf.mxu3 }
 0x1bc   :  { %v444_v62 = vmul.f32 %v2984_v53, %v421_v60  ;;  %v1113_v60 = vpack.c.bf16 %v1085_v41, %v1084_v1 }
 0x1be   :  { %v462_v63 = vadd.f32 %v2987_v55, %v444_v62 }
 0x1c0   :  { %v478_v10 = vmax.f32 %v462_v63, 0.0 }
 0x1c2   :  { %v487_v11 = vpack.c.bf16 %v478_v10, %v477_v5 }
 0x1c3   :  { %v424_v14 = vpop.f32.mrf.mxu3 }
 0x1c4   :  { %592 = vmatmul.bf16.gmra.mxu2 %v487_v11  ;;  %v445_v16 = vmul.f32 %v2984_v53, %v424_v14  ;;  %v1086_v14 = vld [vmem:[#allocation7 + $0x40] sm:$0xff] }
 0x1c6   :  { %v463_v17 = vadd.f32 %v2987_v55, %v445_v16  ;;  %v1087_v16 = vld [vmem:[#allocation7 + $0x48] sm:$0xff] }
 0x1c8   :  { %v479_v20 = vmax.f32 %v463_v17, 0.0 }
 0x1cb   :  { %v426_v15 = vpop.f32.mrf.mxu3 }
 0x1cc   :  { %v446_v18 = vmul.f32 %v2984_v53, %v426_v15 }
 0x1ce   :  { %v464_v19 = vadd.f32 %v2987_v55, %v446_v18  ;;  %v1114_v18 = vpack.c.bf16 %v1087_v16, %v1086_v14 }
 0x1d0   :  { %v480_v21 = vmax.f32 %v464_v19, 0.0 }
 0x1d2   :  { %v488_v13 = vpack.c.bf16 %v480_v21, %v479_v20  ;;  %v1088_v21 = vld [vmem:[#allocation7 + $0x50] sm:$0xff] }
 0x1d4   :  { %597 = vmatmul.bf16.gmra.mxu2 %v488_v13  ;;  %v1089_v13 = vld [vmem:[#allocation7 + $0x58] sm:$0xff] }
 0x1d5   :  { %v1115_v22 = vpack.c.bf16 %v1089_v13, %v1088_v21 }
 0x1e1   :  { %v563_v29 = vpop.f32.mrf.mxu2 }
 0x1e2   :  { %v605_v32 = vmul.f32 %v3020_v30, %v563_v29  ;;  %v1090_v29 = vld [vmem:[#allocation7 + $0x60] sm:$0xff] }
 0x1e4   :  { %1191 = vmatmul.bf16.vlgmr.msrb.gmra.mxu2 %v1110_v23  ;;  %v3026_v53 = vadd.f32 %v3023_v9, %v605_v32  ;;  %v1091_v32 = vld [vmem:[#allocation7 + $0x68] sm:$0xff] }
 0x1e6   :  { %v639_v37 = vmax.f32 %v3026_v53, 0.0 }
 0x1e9   :  { %v565_v8 = vpop.f32.mrf.mxu2 }
 0x1ea   :  { %v606_v55 = vmul.f32 %v3020_v30, %v565_v8 }
 0x1ec   :  { %v3030_v33 = vadd.f32 %v3023_v9, %v606_v55  ;;  %v1116_v55 = vpack.c.bf16 %v1091_v32, %v1090_v29 }
 0x1ee   :  { %v640_v7 = vmax.f32 %v3030_v33, 0.0 }
 0x1f0   :  { %v3038_v38 = vpack.c.bf16 %v640_v7, %v639_v37 }
 0x1f1   :  { %v568_v40 = vpop.f32.mrf.mxu2 }
 0x1f2   :  { %v607_v42 = vmul.f32 %v3020_v30, %v568_v40 }
 0x1f4   :  { %1196 = vmatmul.bf16.gmra.mxu2 %v1111_v6  ;;  %v3042_v44 = vadd.f32 %v3023_v9, %v607_v42  ;;  %v1093_v6 = vld [vmem:[#allocation7 + $0x78] sm:$0xff] }
 0x1f5   :  { %v1117_v42 = vpack.c.bf16 %v1093_v6, %v1092_v36 }
 0x1f6   :  { %v641_v3 = vmax.f32 %v3042_v44, 0.0 }
 0x1f9   :  { %v570_v43 = vpop.f32.mrf.mxu2 }
 0x1fa   :  { %v608_v45 = vmul.f32 %v3020_v30, %v570_v43 }
 0x1fc   :  { %v3046_v46 = vadd.f32 %v3023_v9, %v608_v45 }
 0x1fe   :  { %v642_v48 = vmax.f32 %v3046_v46, 0.0 }
 0x200   :  { %v3054_v50 = vpack.c.bf16 %v642_v48, %v641_v3 }
 0x201   :  { %v573_v51 = vpop.f32.mrf.mxu2 }
 0x202   :  { %v609_v52 = vmul.f32 %v3020_v30, %v573_v51 }
 0x204   :  { %1201 = vmatmul.bf16.gmra.mxu2 %v1112_v49  ;;  %v3058_v56 = vadd.f32 %v3023_v9, %v609_v52 }
 0x206   :  { %v643_v58 = vmax.f32 %v3058_v56, 0.0 }
 0x209   :  { %v575_v54 = vpop.f32.mrf.mxu2 }
 0x20a   :  { %v610_v0 = vmul.f32 %v3020_v30, %v575_v54 }
 0x20c   :  { %v3062_v57 = vadd.f32 %v3023_v9, %v610_v0 }
 0x20e   :  { %v644_v59 = vmax.f32 %v3062_v57, 0.0 }
 0x210   :  { %v3070_v61 = vpack.c.bf16 %v644_v59, %v643_v58 }
 0x211   :  { %v578_v62 = vpop.f32.mrf.mxu2 }
 0x212   :  { %v611_v63 = vmul.f32 %v3020_v30, %v578_v62 }
 0x214   :  { %1206 = vmatmul.bf16.gmra.mxu2 %v1113_v60  ;;  %v3074_v5 = vadd.f32 %v3023_v9, %v611_v63 }
 0x216   :  { %v645_v15 = vmax.f32 %v3074_v5, 0.0 }
 0x219   :  { %v580_v2 = vpop.f32.mrf.mxu2 }
 0x21a   :  { %v612_v10 = vmul.f32 %v3020_v30, %v580_v2 }
 0x21c   :  { %v3078_v11 = vadd.f32 %v3023_v9, %v612_v10 }
 0x21e   :  { %v646_v17 = vmax.f32 %v3078_v11, 0.0 }
 0x220   :  { %v658_v19 = vpack.c.bf16 %v646_v17, %v645_v15 }
 0x221   :  { %v583_v20 = vpop.f32.mrf.mxu2 }
 0x222   :  { %v613_v21 = vmul.f32 %v3020_v30, %v583_v20 }
 0x224   :  { %1211 = vmatmul.bf16.gmra.mxu2 %v1114_v18  ;;  %v3131_v32 = vadd.f32 %v3023_v9, %v613_v21  ;;  %v2452_v21 = vld [vmem:[#allocation13 + $0x48] sm:$0xff] }
 0x229   :  { %v585_v12 = vpop.f32.mrf.mxu2 }
 0x22a   :  { %v614_v2 = vmul.f32 %v3020_v30, %v585_v12 }
 0x22c   :  { %v3123_v12 = vadd.f32 %v3023_v9, %v614_v2  ;;  %v2454_v2 = vld [vmem:[#allocation13 + $0x58] sm:$0xff] }
 0x234   :  { %1216 = vmatmul.bf16.gmra.mxu2 %v1115_v22 }
 0x237   :  { %v588_v23 = vpop.f32.mrf.mxu2 }
 0x238   :  { %v615_v41 = vmul.f32 %v3020_v30, %v588_v23 }
 0x23a   :  { %v3119_v13 = vadd.f32 %v3023_v9, %v615_v41  ;;  %v2455_v41 = vld [vmem:[#allocation13 + $0x60] sm:$0xff] }
 0x23f   :  { %v590_v8 = vpop.f32.mrf.mxu2 }
 0x240   :  { %v616_v54 = vmul.f32 %v3020_v30, %v590_v8  ;;  %v648_v8 = vmax.f32 %v3123_v12, 0.0 }
 0x242   :  { %v3108_v10 = vadd.f32 %v3023_v9, %v616_v54 }
 0x244   :  { %1221 = vmatmul.bf16.gmra.mxu2 %v1116_v55  ;;  %v650_v29 = vmax.f32 %v3108_v10, 0.0  ;;  %v2486_v10 = vld [vmem:[#allocation13 + $0x158] sm:$0xff] }
 0x247   :  { %v593_v34 = vpop.f32.mrf.mxu2 }
 0x248   :  { %v617_v49 = vmul.f32 %v3020_v30, %v593_v34  ;;  %v647_v34 = vmax.f32 %v3131_v32, 0.0 }
 0x24a   :  { %v3102_v60 = vadd.f32 %v3023_v9, %v617_v49  ;;  %v2458_v49 = vld [vmem:[#allocation13 + $0x78] sm:$0xff] }
 0x24b   :  { %803 = vmatpush.bf16.msra.mxu0 %v2458_v49 }
 0x24c   :  { %v651_v22 = vmax.f32 %v3102_v60, 0.0  ;;  %v2461_v60 = vld [vmem:[#allocation13 + $0xd0] sm:$0xff] }
 0x24f   :  { %v595_v40 = vpop.f32.mrf.mxu2 }
 0x250   :  { %v618_v47 = vmul.f32 %v3020_v30, %v595_v40 }
 0x252   :  { %v3095_v0 = vadd.f32 %v3023_v9, %v618_v47 }
 0x254   :  { %1226 = vmatmul.bf16.gmra.mxu2 %v1117_v42  ;;  %v652_v16 = vmax.f32 %v3095_v0, 0.0 }
 0x256   :  { %v661_v23 = vpack.c.bf16 %v652_v16, %v651_v22 }
 0x257   :  { %v598_v43 = vpop.f32.mrf.mxu2 }
 0x258   :  { %v619_v45 = vmul.f32 %v3020_v30, %v598_v43 }
 0x25a   :  { %v3090_v51 = vadd.f32 %v3023_v9, %v619_v45 }
 0x25c   :  { %v653_v62 = vmax.f32 %v3090_v51, 0.0 }
 0x25f   :  { %v600_v4 = vpop.f32.mrf.mxu2 }
 0x260   :  { %v620_v52 = vmul.f32 %v3020_v30, %v600_v4  ;;  %v649_v30 = vmax.f32 %v3119_v13, 0.0  ;;  %v2465_v13 = vld [vmem:[#allocation13 + $0xf0] sm:$0xff] }
 0x262   :  { %v3098_v1 = vadd.f32 %v3023_v9, %v620_v52  ;;  %v660_v20 = vpack.c.bf16 %v650_v29, %v649_v30  ;;  %v659_v9 = vpack.c.bf16 %v648_v8, %v647_v34  ;;  %v2456_v52 = vld [vmem:[#allocation13 + $0x68] sm:$0xff] }
 0x264   :  { %v654_v63 = vmax.f32 %v3098_v1, 0.0 }
 0x266   :  { %v662_v14 = vpack.c.bf16 %v654_v63, %v653_v62 }
 0x267   :  { %v3115_v18 = vpop.f32.mrf.mxu2 }
 0x268   :  { %681 = vmatpush.bf16.msrb.mxu3 %v662_v14 }
 0x26c   :  { %682 = vmatpush.bf16.msrb.mxu3 %v661_v23 }
 0x26f   :  { %v1194_v55 = vpop.f32.mrf.mxu2 }
 0x270   :  { %683 = vmatpush.bf16.msrb.mxu3 %v660_v20  ;;  %v2451_v20 = vld [vmem:[#allocation13 + $0x40] sm:$0xff] }
 0x274   :  { %684 = vmatpush.bf16.msrb.mxu3 %v659_v9 }
 0x277   :  { %v1197_v36 = vpop.f32.mrf.mxu2 }
 0x278   :  { %685 = vmatpush.bf16.msrb.mxu3 %v658_v19 }
 0x27c   :  { %686 = vmatpush.bf16.msrb.mxu3 %v3070_v61 }
 0x27f   :  { %v1199_v6 = vpop.f32.mrf.mxu2 }
 0x280   :  { %687 = vmatpush.bf16.msrb.mxu3 %v3054_v50 }
 0x284   :  { %688 = vmatpush.bf16.msrb.mxu3 %v3038_v38 }
 0x287   :  { %689 = vmatmul.bf16.vlgmr.msrb.gmra.mxu3 %v2928_v24  ;;  %v1202_v40 = vpop.f32.mrf.mxu2 }
 0x28f   :  { %v1204_v42 = vpop.f32.mrf.mxu2 }
 0x290   :  { %v1234_v9 = vpack.c.bf16 %v1204_v42, %v1202_v40 }
 0x297   :  { %694 = vmatmul.bf16.gmra.mxu3 %v2931_v25  ;;  %v1207_v43 = vpop.f32.mrf.mxu2  ;;  %v2457_v25 = vld [vmem:[#allocation13 + $0x70] sm:$0xff] }
 0x298   :  { %804 = vmatpush.bf16.msra.mxu0 %v2457_v25  ;;  %v3185_v25 = vld [vmem:[#allocation8 + $0x18] sm:$0xff] }
 0x29c   :  { %805 = vmatpush.bf16.msra.mxu0 %v2456_v52 }
 0x29f   :  { %v1209_v45 = vpop.f32.mrf.mxu2 }
 0x2a0   :  { %806 = vmatpush.bf16.msra.mxu0 %v2455_v41  ;;  %v1235_v23 = vpack.c.bf16 %v1209_v45, %v1207_v43  ;;  %v3194_v41 = vld [vmem:[#allocation8 + $0x20] sm:$0xff] }
 0x2a4   :  { %807 = vmatpush.bf16.msra.mxu0 %v2454_v2 }
 0x2a7   :  { %699 = vmatmul.bf16.gmra.mxu3 %v2934_v26  ;;  %v1212_v47 = vpop.f32.mrf.mxu2 }
 0x2af   :  { %v1214_v4 = vpop.f32.mrf.mxu2 }
 0x2b0   :  { %v1236_v14 = vpack.c.bf16 %v1214_v4, %v1212_v47  ;;  %v3159_v4 = vld [vmem:[#allocation14 + $0x5] ss:$0 sm:$0xff] }
 0x2b1   :  { %v665_v40 = vmul.f32 %v3159_v4, %v639_v37  ;;  %v667_v53 = vmul.f32 %v3159_v4, %v641_v3  ;;  %v668_v33 = vmul.f32 %v3159_v4, %v642_v48  ;;  %v669_v44 = vmul.f32 %v3159_v4, %v643_v58 }
 0x2b2   :  { %v670_v46 = vmul.f32 %v3159_v4, %v644_v59  ;;  %v671_v56 = vmul.f32 %v3159_v4, %v645_v15  ;;  %v672_v57 = vmul.f32 %v3159_v4, %v646_v17  ;;  %v673_v5 = vmul.f32 %v3159_v4, %v647_v34  ;;  %v2488_v34 = vld [vmem:[#allocation13 + $0x168] sm:$0xff] }
 0x2b3   :  { %v674_v11 = vmul.f32 %v3159_v4, %v648_v8  ;;  %v675_v12 = vmul.f32 %v3159_v4, %v649_v30  ;;  %v676_v32 = vmul.f32 %v3159_v4, %v650_v29  ;;  %v2464_v29 = vld [vmem:[#allocation13 + $0xe8] sm:$0xff] }
 0x2b7   :  { %704 = vmatmul.bf16.gmra.mxu3 %v2937_v27  ;;  %v1217_v61 = vpop.f32.mrf.mxu2 }
 0x2bf   :  { %v1219_v19 = vpop.f32.mrf.mxu2 }
 0x2c7   :  { %709 = vmatmul.bf16.gmra.mxu3 %v2940_v28  ;;  %v1222_v50 = vpop.f32.mrf.mxu2  ;;  %v1237_v28 = vpack.c.bf16 %v1219_v19, %v1217_v61  ;;  %v3156_v61 = vld [vmem:[#allocation8] sm:$0xff]  ;;  %v3176_v19 = vld [vmem:[#allocation8 + $0x10] sm:$0xff] }
 0x2cf   :  { %v1224_v38 = vpop.f32.mrf.mxu2 }
 0x2d0   :  { %v1238_v27 = vpack.c.bf16 %v1224_v38, %v1222_v50  ;;  %v1233_v50 = vpack.c.bf16 %v1199_v6, %v1197_v36 }
 0x2d7   :  { %714 = vmatmul.bf16.gmra.mxu3 %v2943_v31  ;;  %v1227_v24 = vpop.f32.mrf.mxu2  ;;  %v2453_v31 = vld [vmem:[#allocation13 + $0x50] sm:$0xff] }
 0x2d8   :  { %808 = vmatpush.bf16.msra.mxu0 %v2453_v31  ;;  %v3203_v31 = vld [vmem:[#allocation8 + $0x28] sm:$0xff] }
 0x2dc   :  { %809 = vmatpush.bf16.msra.mxu0 %v2452_v21 }
 0x2df   :  { %v1229_v54 = vpop.f32.mrf.mxu2 }
 0x2e0   :  { %v1239_v26 = vpack.c.bf16 %v1229_v54, %v1227_v24  ;;  %810 = vmatpush.bf16.msra.mxu0 %v2451_v20  ;;  %v2489_v20 = vld [vmem:[#allocation13 + $0x170] sm:$0xff] }
 0x2e2   :  { %1288 = vmatpush.bf16.msra.mxu3 %v1239_v26 }
 0x2e6   :  { %1289 = vmatpush.bf16.msra.mxu3 %v1238_v27 }
 0x2e7   :  { %719 = vmatmul.bf16.gmra.mxu3 %v2946_v35  ;;  %v1232_v35 = vpack.c.bf16 %v1194_v55, %v3115_v18  ;;  %v3167_v18 = vld [vmem:[#allocation8 + $0x8] sm:$0xff] }
 0x2ea   :  { %1290 = vmatpush.bf16.msra.mxu3 %v1237_v28 }
 0x2ee   :  { %1291 = vmatpush.bf16.msra.mxu3 %v1236_v14 }
 0x2f2   :  { %1292 = vmatpush.bf16.msra.mxu3 %v1235_v23  ;;  %v2490_v23 = vld [vmem:[#allocation13 + $0x178] sm:$0xff] }
 0x2f3   :  { %1462 = vmatpush.bf16.msrb.mxu0 %v2490_v23 }
 0x2f6   :  { %1293 = vmatpush.bf16.msra.mxu3 %v1234_v9 }
 0x2f7   :  { %724 = vmatmul.bf16.gmra.mxu3 %v2949_v39  ;;  %v666_v39 = vmul.f32 %v3159_v4, %v640_v7  ;;  %1463 = vmatpush.bf16.msrb.mxu0 %v2489_v20 }
 0x2fa   :  { %1294 = vmatpush.bf16.msra.mxu3 %v1233_v50 }
 0x2fb   :  { %1464 = vmatpush.bf16.msrb.mxu0 %v2488_v34 }
 0x2fe   :  { %1295 = vmatpush.bf16.msra.mxu3 %v1232_v35  ;;  %v3212_v35 = vld [vmem:[#allocation8 + $0x30] sm:$0xff] }
 0x307   :  { %1296 = vmatmul.bf16.vlgmr.msra.gmra.mxu3 %v3156_v61 }
 0x30a   :  { %v690_v47 = vpop.f32.mrf.mxu3 }
 0x30b   :  { %v691_v6 = vadd.f32 %v690_v47, %v665_v40  ;;  %v2466_v47 = vld [vmem:[#allocation13 + $0xf8] sm:$0xff] }
 0x30c   :  { %977 = vmatpush.bf16.msrb.mxu1 %v2466_v47 }
 0x310   :  { %978 = vmatpush.bf16.msrb.mxu1 %v2465_v13 }
 0x312   :  { %v692_v36 = vpop.f32.mrf.mxu3 }
 0x313   :  { %v693_v42 = vadd.f32 %v692_v36, %v666_v39  ;;  %v2487_v39 = vld [vmem:[#allocation13 + $0x160] sm:$0xff]  ;;  %v2485_v36 = vld [vmem:[#allocation13 + $0x150] sm:$0xff] }
 0x314   :  { %1465 = vmatpush.bf16.msrb.mxu0 %v2487_v39  ;;  %979 = vmatpush.bf16.msrb.mxu1 %v2464_v29 }
 0x315   :  { %v730_v55 = vpack.c.bf16 %v693_v42, %v691_v6  ;;  %v2463_v6 = vld [vmem:[#allocation13 + $0xe0] sm:$0xff]  ;;  %v677_v42 = vmul.f32 %v3159_v4, %v651_v22 }
 0x316   :  { %v2459_v22 = vld [vmem:[#allocation13 + $0xc0] sm:$0xff] }
 0x317   :  { %811 = vmatmul.bf16.vlgmr.msra.gmra.mxu0 %v730_v55  ;;  %1301 = vmatmul.bf16.gmra.mxu3 %v3167_v18  ;;  %v678_v55 = vmul.f32 %v3159_v4, %v652_v16  ;;  %v2460_v16 = vld [vmem:[#allocation13 + $0xc8] sm:$0xff] }
 0x318   :  { %1466 = vmatpush.bf16.msrb.mxu0 %v2486_v10  ;;  %980 = vmatpush.bf16.msrb.mxu1 %v2463_v6 }
 0x31a   :  { %v695_v43 = vpop.f32.mrf.mxu3 }
 0x31b   :  { %v696_v7 = vadd.f32 %v695_v43, %v667_v53  ;;  %v2484_v53 = vld [vmem:[#allocation13 + $0x148] sm:$0xff] }
 0x31c   :  { %1467 = vmatpush.bf16.msrb.mxu0 %v2485_v36 }
 0x320   :  { %1468 = vmatpush.bf16.msrb.mxu0 %v2484_v53 }
 0x322   :  { %v697_v37 = vpop.f32.mrf.mxu3 }
 0x323   :  { %v698_v45 = vadd.f32 %v697_v37, %v668_v33 }
 0x325   :  { %v731_v38 = vpack.c.bf16 %v698_v45, %v696_v7  ;;  %v3221_v7 = vld [vmem:[#allocation8 + $0x38] sm:$0xff] }
 0x326   :  { %v2462_v45 = vld [vmem:[#allocation13 + $0xd8] sm:$0xff] }
 0x327   :  { %816 = vmatmul.bf16.gmra.mxu0 %v731_v38  ;;  %1306 = vmatmul.bf16.gmra.mxu3 %v3176_v19 }
 0x328   :  { %981 = vmatpush.bf16.msrb.mxu1 %v2462_v45 }
 0x32a   :  { %v700_v49 = vpop.f32.mrf.mxu3 }
 0x32b   :  { %v701_v48 = vadd.f32 %v700_v49, %v669_v44  ;;  %v2483_v49 = vld [vmem:[#allocation13 + $0x140] sm:$0xff]  ;;  %v679_v44 = vmul.f32 %v3159_v4, %v653_v62 }
 0x32c   :  { %1469 = vmatpush.bf16.msrb.mxu0 %v2483_v49  ;;  %982 = vmatpush.bf16.msrb.mxu1 %v2461_v60 }
 0x330   :  { %983 = vmatpush.bf16.msrb.mxu1 %v2460_v16 }
 0x332   :  { %v702_v3 = vpop.f32.mrf.mxu3 }
 0x333   :  { %v703_v24 = vadd.f32 %v702_v3, %v670_v46  ;;  %v680_v46 = vmul.f32 %v3159_v4, %v654_v63  ;;  %v3238_v4 = vld [vmem:[#allocation14 + $0x6] ss:$0 sm:$0xff] }
 0x334   :  { %984 = vmatpush.bf16.msrb.mxu1 %v2459_v22 }
 0x335   :  { %v732_v52 = vpack.c.bf16 %v703_v24, %v701_v48 }
 0x337   :  { %821 = vmatmul.bf16.gmra.mxu0 %v732_v52  ;;  %1311 = vmatmul.bf16.gmra.mxu3 %v3185_v25 }
 0x33a   :  { %v705_v54 = vpop.f32.mrf.mxu3 }
 0x33b   :  { %v706_v59 = vadd.f32 %v705_v54, %v671_v56  ;;  %v3230_v56 = vld [vmem:[#allocation14 + $0xa] ss:$0 sm:$0xff] }
 0x342   :  { %v707_v58 = vpop.f32.mrf.mxu3 }
 0x343   :  { %v708_v26 = vadd.f32 %v707_v58, %v672_v57  ;;  %v3233_v58 = vld [vmem:[#allocation14 + $0xb] ss:$0 sm:$0xff] }
 0x345   :  { %v733_v27 = vpack.c.bf16 %v708_v26, %v706_v59 }
 0x347   :  { %826 = vmatmul.bf16.gmra.mxu0 %v733_v27  ;;  %1316 = vmatmul.bf16.gmra.mxu3 %v3194_v41 }
 0x34a   :  { %v710_v2 = vpop.f32.mrf.mxu3 }
 0x34b   :  { %v711_v17 = vadd.f32 %v710_v2, %v673_v5 }
 0x352   :  { %v712_v15 = vpop.f32.mrf.mxu3 }
 0x353   :  { %v713_v28 = vadd.f32 %v712_v15, %v674_v11  ;;  %v3241_v11 = vld [vmem:[#allocation14 + $0x7] ss:$0 sm:$0xff] }
 0x355   :  { %v734_v14 = vpack.c.bf16 %v713_v28, %v711_v17 }
 0x357   :  { %831 = vmatmul.bf16.gmra.mxu0 %v734_v14  ;;  %1321 = vmatmul.bf16.gmra.mxu3 %v3203_v31 }
 0x35a   :  { %v715_v21 = vpop.f32.mrf.mxu3 }
 0x35b   :  { %v716_v9 = vadd.f32 %v715_v21, %v675_v12 }
 0x362   :  { %v717_v8 = vpop.f32.mrf.mxu3 }
 0x363   :  { %v718_v50 = vadd.f32 %v717_v8, %v676_v32 }
 0x365   :  { %v735_v40 = vpack.c.bf16 %v718_v50, %v716_v9 }
 0x367   :  { %836 = vmatmul.bf16.gmra.mxu0 %v735_v40  ;;  %1326 = vmatmul.bf16.gmra.mxu3 %v3212_v35 }
 0x36a   :  { %v720_v30 = vpop.f32.mrf.mxu3 }
 0x36b   :  { %v721_v33 = vadd.f32 %v720_v30, %v677_v42 }
 0x372   :  { %v722_v43 = vpop.f32.mrf.mxu3 }
 0x373   :  { %v723_v37 = vadd.f32 %v722_v43, %v678_v55 }
 0x375   :  { %v736_v38 = vpack.c.bf16 %v723_v37, %v721_v33 }
 0x377   :  { %841 = vmatmul.bf16.gmra.mxu0 %v736_v38  ;;  %1331 = vmatmul.bf16.gmra.mxu3 %v3221_v7 }
 0x37a   :  { %v725_v0 = vpop.f32.mrf.mxu3 }
 0x37b   :  { %v726_v48 = vadd.f32 %v725_v0, %v679_v44 }
 0x382   :  { %v727_v3 = vpop.f32.mrf.mxu3 }
 0x383   :  { %v728_v24 = vadd.f32 %v727_v3, %v680_v46 }
 0x385   :  { %v737_v52 = vpack.c.bf16 %v728_v24, %v726_v48 }
 0x387   :  { %846 = vmatmul.bf16.gmra.mxu0 %v737_v52 }
 0x38a   :  { %v1297_v54 = vpop.f32.mrf.mxu3 }
 0x38b   :  { %v1339_v57 = vmul.f32 %v3230_v56, %v1297_v54 }
 0x38d   :  { %v1357_v62 = vadd.f32 %v3233_v58, %v1339_v57 }
 0x38f   :  { %v1373_v26 = vmax.f32 %v1357_v62, 0.0 }
 0x392   :  { %v1299_v51 = vpop.f32.mrf.mxu3 }
 0x393   :  { %v1340_v1 = vmul.f32 %v3230_v56, %v1299_v51 }
 0x394   :  { %v812_v59 = vpop.f32.mrf.mxu0 }
 0x395   :  { %v1358_v63 = vadd.f32 %v3233_v58, %v1340_v1  ;;  %v854_v5 = vmul.f32 %v3238_v4, %v812_v59 }
 0x397   :  { %v1374_v27 = vmax.f32 %v1358_v63, 0.0  ;;  %v872_v28 = vadd.f32 %v3241_v11, %v854_v5 }
 0x399   :  { %v1389_v2 = vpack.c.bf16 %v1374_v27, %v1373_v26  ;;  %v888_v20 = vmax.f32 %v872_v28, 0.0 }
 0x39a   :  { %v1302_v15 = vpop.f32.mrf.mxu3 }
 0x39b   :  { %1470 = vmatmul.bf16.vlgmr.msrb.gmra.mxu0 %v1389_v2  ;;  %v1341_v21 = vmul.f32 %v3230_v56, %v1302_v15 }
 0x39c   :  { %v814_v17 = vpop.f32.mrf.mxu0 }
 0x39d   :  { %v855_v14 = vmul.f32 %v3238_v4, %v814_v17  ;;  %v1359_v8 = vadd.f32 %v3233_v58, %v1341_v21 }
 0x39f   :  { %v873_v23 = vadd.f32 %v3241_v11, %v855_v14  ;;  %v1375_v40 = vmax.f32 %v1359_v8, 0.0 }
 0x3a1   :  { %v889_v12 = vmax.f32 %v873_v23, 0.0 }
 0x3a2   :  { %v1304_v32 = vpop.f32.mrf.mxu3 }
 0x3a3   :  { %v1342_v34 = vmul.f32 %v3230_v56, %v1304_v32  ;;  %v904_v9 = vpack.c.bf16 %v889_v12, %v888_v20 }
 0x3a4   :  { %v817_v50 = vpop.f32.mrf.mxu0 }
 0x3a5   :  { %v1360_v47 = vadd.f32 %v3233_v58, %v1342_v34  ;;  %985 = vmatmul.bf16.vlgmr.msrb.gmra.mxu1 %v904_v9  ;;  %v856_v13 = vmul.f32 %v3238_v4, %v817_v50 }
 0x3a7   :  { %v1376_v39 = vmax.f32 %v1360_v47, 0.0  ;;  %v874_v36 = vadd.f32 %v3241_v11, %v856_v13 }
 0x3a9   :  { %v1390_v30 = vpack.c.bf16 %v1376_v39, %v1375_v40  ;;  %v890_v43 = vmax.f32 %v874_v36, 0.0 }
 0x3aa   :  { %v1307_v10 = vpop.f32.mrf.mxu3 }
 0x3ab   :  { %1475 = vmatmul.bf16.gmra.mxu0 %v1390_v30  ;;  %v1343_v42 = vmul.f32 %v3230_v56, %v1307_v10 }
 0x3ac   :  { %v819_v29 = vpop.f32.mrf.mxu0 }
 0x3ad   :  { %v857_v6 = vmul.f32 %v3238_v4, %v819_v29  ;;  %v1361_v37 = vadd.f32 %v3233_v58, %v1343_v42 }
 0x3af   :  { %v875_v55 = vadd.f32 %v3241_v11, %v857_v6  ;;  %v1377_v0 = vmax.f32 %v1361_v37, 0.0 }
 0x3b1   :  { %v891_v53 = vmax.f32 %v875_v55, 0.0 }
 0x3b2   :  { %v1309_v33 = vpop.f32.mrf.mxu3 }
 0x3b3   :  { %v1344_v45 = vmul.f32 %v3230_v56, %v1309_v33  ;;  %v905_v38 = vpack.c.bf16 %v891_v53, %v890_v43 }
 0x3b4   :  { %v822_v49 = vpop.f32.mrf.mxu0 }
 0x3b5   :  { %v1362_v60 = vadd.f32 %v3233_v58, %v1344_v45  ;;  %990 = vmatmul.bf16.gmra.mxu1 %v905_v38  ;;  %v858_v22 = vmul.f32 %v3238_v4, %v822_v49 }
 0x3b7   :  { %v1378_v16 = vmax.f32 %v1362_v60, 0.0  ;;  %v876_v48 = vadd.f32 %v3241_v11, %v858_v22 }
 0x3b9   :  { %v1391_v44 = vpack.c.bf16 %v1378_v16, %v1377_v0  ;;  %v892_v57 = vmax.f32 %v876_v48, 0.0 }
 0x3ba   :  { %v1312_v46 = vpop.f32.mrf.mxu3 }
 0x3bb   :  { %1480 = vmatmul.bf16.gmra.mxu0 %v1391_v44  ;;  %v1345_v52 = vmul.f32 %v3230_v56, %v1312_v46 }
 0x3bc   :  { %v824_v3 = vpop.f32.mrf.mxu0 }
 0x3bd   :  { %v859_v24 = vmul.f32 %v3238_v4, %v824_v3  ;;  %v1363_v1 = vadd.f32 %v3233_v58, %v1345_v52 }
 0x3bf   :  { %v877_v54 = vadd.f32 %v3241_v11, %v859_v24  ;;  %v1379_v2 = vmax.f32 %v1363_v1, 0.0 }
 0x3c1   :  { %v893_v51 = vmax.f32 %v877_v54, 0.0 }
 0x3c2   :  { %v1314_v62 = vpop.f32.mrf.mxu3 }
 0x3c3   :  { %v1346_v59 = vmul.f32 %v3230_v56, %v1314_v62  ;;  %v906_v63 = vpack.c.bf16 %v893_v51, %v892_v57 }
 0x3c4   :  { %v827_v26 = vpop.f32.mrf.mxu0 }
 0x3c5   :  { %v1364_v27 = vadd.f32 %v3233_v58, %v1346_v59  ;;  %995 = vmatmul.bf16.gmra.mxu1 %v906_v63  ;;  %v860_v15 = vmul.f32 %v3238_v4, %v827_v26  ;;  %v2498_v59 = vld [vmem:[#allocation13 + $0x1b8] sm:$0xff] }
 0x3c6   :  { %1695 = vmatpush.bf16.msra.mxu2 %v2498_v59 }
 0x3c7   :  { %v1380_v5 = vmax.f32 %v1364_v27, 0.0  ;;  %v878_v21 = vadd.f32 %v3241_v11, %v860_v15 }
 0x3c9   :  { %v1392_v17 = vpack.c.bf16 %v1380_v5, %v1379_v2  ;;  %v894_v32 = vmax.f32 %v878_v21, 0.0  ;;  %v2496_v21 = vld [vmem:[#allocation13 + $0x1a8] sm:$0xff] }
 0x3ca   :  { %v1317_v28 = vpop.f32.mrf.mxu3 }
 0x3cb   :  { %1485 = vmatmul.bf16.gmra.mxu0 %v1392_v17  ;;  %v1347_v20 = vmul.f32 %v3230_v56, %v1317_v28  ;;  %v2497_v17 = vld [vmem:[#allocation13 + $0x1b0] sm:$0xff] }
 0x3cc   :  { %v829_v14 = vpop.f32.mrf.mxu0  ;;  %1696 = vmatpush.bf16.msra.mxu2 %v2497_v17 }
 0x3cd   :  { %v861_v23 = vmul.f32 %v3238_v4, %v829_v14  ;;  %v1365_v9 = vadd.f32 %v3233_v58, %v1347_v20 }
 0x3cf   :  { %v879_v12 = vadd.f32 %v3241_v11, %v861_v23  ;;  %v1381_v13 = vmax.f32 %v1365_v9, 0.0  ;;  %v2495_v9 = vld [vmem:[#allocation13 + $0x1a0] sm:$0xff] }
 0x3d0   :  { %1697 = vmatpush.bf16.msra.mxu2 %v2496_v21 }
 0x3d1   :  { %v895_v8 = vmax.f32 %v879_v12, 0.0 }
 0x3d2   :  { %v1319_v34 = vpop.f32.mrf.mxu3 }
 0x3d3   :  { %v1348_v50 = vmul.f32 %v3230_v56, %v1319_v34  ;;  %v907_v47 = vpack.c.bf16 %v895_v8, %v894_v32 }
 0x3d4   :  { %v832_v40 = vpop.f32.mrf.mxu0  ;;  %1698 = vmatpush.bf16.msra.mxu2 %v2495_v9 }
 0x3d5   :  { %v1366_v39 = vadd.f32 %v3233_v58, %v1348_v50  ;;  %1000 = vmatmul.bf16.gmra.mxu1 %v907_v47  ;;  %v862_v10 = vmul.f32 %v3238_v4, %v832_v40 }
 0x3d7   :  { %v1382_v30 = vmax.f32 %v1366_v39, 0.0  ;;  %v880_v42 = vadd.f32 %v3241_v11, %v862_v10 }
 0x3d9   :  { %v1393_v29 = vpack.c.bf16 %v1382_v30, %v1381_v13  ;;  %v896_v33 = vmax.f32 %v880_v42, 0.0  ;;  %v2494_v30 = vld [vmem:[#allocation13 + $0x198] sm:$0xff] }
 0x3da   :  { %v1322_v36 = vpop.f32.mrf.mxu3  ;;  %1699 = vmatpush.bf16.msra.mxu2 %v2494_v30 }
 0x3db   :  { %1490 = vmatmul.bf16.gmra.mxu0 %v1393_v29  ;;  %v1349_v43 = vmul.f32 %v3230_v56, %v1322_v36 }
 0x3dc   :  { %v834_v6 = vpop.f32.mrf.mxu0 }
 0x3dd   :  { %v863_v55 = vmul.f32 %v3238_v4, %v834_v6  ;;  %v1367_v38 = vadd.f32 %v3233_v58, %v1349_v43 }
 0x3df   :  { %v881_v53 = vadd.f32 %v3241_v11, %v863_v55  ;;  %v1383_v22 = vmax.f32 %v1367_v38, 0.0  ;;  %v2493_v55 = vld [vmem:[#allocation13 + $0x190] sm:$0xff] }
 0x3e0   :  { %1700 = vmatpush.bf16.msra.mxu2 %v2493_v55 }
 0x3e1   :  { %v897_v37 = vmax.f32 %v881_v53, 0.0 }
 0x3e2   :  { %v1324_v45 = vpop.f32.mrf.mxu3 }
 0x3e3   :  { %v1350_v49 = vmul.f32 %v3230_v56, %v1324_v45  ;;  %v908_v60 = vpack.c.bf16 %v897_v37, %v896_v33  ;;  %v2492_v45 = vld [vmem:[#allocation13 + $0x188] sm:$0xff] }
 0x3e4   :  { %v837_v0 = vpop.f32.mrf.mxu0  ;;  %1701 = vmatpush.bf16.msra.mxu2 %v2492_v45 }
 0x3e5   :  { %v1368_v16 = vadd.f32 %v3233_v58, %v1350_v49  ;;  %1005 = vmatmul.bf16.gmra.mxu1 %v908_v60  ;;  %v864_v46 = vmul.f32 %v3238_v4, %v837_v0  ;;  %v2491_v60 = vld [vmem:[#allocation13 + $0x180] sm:$0xff] }
 0x3e7   :  { %v1384_v44 = vmax.f32 %v1368_v16, 0.0  ;;  %v882_v52 = vadd.f32 %v3241_v11, %v864_v46 }
 0x3e8   :  { %1702 = vmatpush.bf16.msra.mxu2 %v2491_v60 }
 0x3e9   :  { %v1394_v3 = vpack.c.bf16 %v1384_v44, %v1383_v22  ;;  %v898_v62 = vmax.f32 %v882_v52, 0.0  ;;  %v3311_v52 = vld [vmem:[#allocation14 + $0x9] ss:$0 sm:$0xff] }
 0x3ea   :  { %v1327_v48 = vpop.f32.mrf.mxu3 }
 0x3eb   :  { %1495 = vmatmul.bf16.gmra.mxu0 %v1394_v3  ;;  %v1351_v57 = vmul.f32 %v3230_v56, %v1327_v48 }
 0x3ec   :  { %v839_v24 = vpop.f32.mrf.mxu0 }
 0x3ed   :  { %v865_v54 = vmul.f32 %v3238_v4, %v839_v24  ;;  %v1369_v26 = vadd.f32 %v3233_v58, %v1351_v57  ;;  %v3308_v24 = vld [vmem:[#allocation14 + $0x8] ss:$0 sm:$0xff] }
 0x3ef   :  { %v883_v51 = vadd.f32 %v3241_v11, %v865_v54  ;;  %v1385_v28 = vmax.f32 %v1369_v26, 0.0 }
 0x3f1   :  { %v899_v1 = vmax.f32 %v883_v51, 0.0 }
 0x3f2   :  { %v1329_v63 = vpop.f32.mrf.mxu3 }
 0x3f3   :  { %v1352_v27 = vmul.f32 %v3230_v56, %v1329_v63  ;;  %v909_v2 = vpack.c.bf16 %v899_v1, %v898_v62 }
 0x3f4   :  { %v842_v5 = vpop.f32.mrf.mxu0 }
 0x3f5   :  { %v1370_v15 = vadd.f32 %v3233_v58, %v1352_v27  ;;  %1010 = vmatmul.bf16.gmra.mxu1 %v909_v2  ;;  %v866_v23 = vmul.f32 %v3238_v4, %v842_v5 }
 0x3f7   :  { %v1386_v14 = vmax.f32 %v1370_v15, 0.0  ;;  %v884_v8 = vadd.f32 %v3241_v11, %v866_v23 }
 0x3f9   :  { %v1395_v20 = vpack.c.bf16 %v1386_v14, %v1385_v28  ;;  %v900_v40 = vmax.f32 %v884_v8, 0.0 }
 0x3fa   :  { %v1332_v12 = vpop.f32.mrf.mxu3 }
 0x3fb   :  { %1500 = vmatmul.bf16.gmra.mxu0 %v1395_v20  ;;  %v1353_v50 = vmul.f32 %v3230_v56, %v1332_v12 }
 0x3fc   :  { %v844_v32 = vpop.f32.mrf.mxu0 }
 0x3fd   :  { %v867_v34 = vmul.f32 %v3238_v4, %v844_v32  ;;  %v1371_v10 = vadd.f32 %v3233_v58, %v1353_v50 }
 0x3ff   :  { %v885_v47 = vadd.f32 %v3241_v11, %v867_v34  ;;  %v1387_v43 = vmax.f32 %v1371_v10, 0.0 }
 0x401   :  { %v901_v39 = vmax.f32 %v885_v47, 0.0 }
 0x402   :  { %v1334_v13 = vpop.f32.mrf.mxu3 }
 0x403   :  { %v1354_v29 = vmul.f32 %v3230_v56, %v1334_v13  ;;  %v910_v36 = vpack.c.bf16 %v901_v39, %v900_v40 }
 0x404   :  { %v847_v6 = vpop.f32.mrf.mxu0 }
 0x405   :  { %v1372_v42 = vadd.f32 %v3233_v58, %v1354_v29  ;;  %1015 = vmatmul.bf16.gmra.mxu1 %v910_v36  ;;  %v868_v33 = vmul.f32 %v3238_v4, %v847_v6 }
 0x407   :  { %v1388_v53 = vmax.f32 %v1372_v42, 0.0  ;;  %v886_v49 = vadd.f32 %v3241_v11, %v868_v33 }
 0x409   :  { %v1396_v37 = vpack.c.bf16 %v1388_v53, %v1387_v43  ;;  %v902_v58 = vmax.f32 %v886_v49, 0.0 }
 0x40b   :  { %1505 = vmatmul.bf16.gmra.mxu0 %v1396_v37 }
 0x40c   :  { %v849_v38 = vpop.f32.mrf.mxu0 }
 0x40d   :  { %v869_v56 = vmul.f32 %v3238_v4, %v849_v38 }
 0x40f   :  { %v887_v0 = vadd.f32 %v3241_v11, %v869_v56 }
 0x411   :  { %v903_v16 = vmax.f32 %v887_v0, 0.0 }
 0x413   :  { %v911_v22 = vpack.c.bf16 %v903_v16, %v902_v58 }
 0x415   :  { %1020 = vmatmul.bf16.gmra.mxu1 %v911_v22 }
 0x418   :  { %v3302_v44 = vpop.f32.mrf.mxu0 }
 0x420   :  { %v3304_v46 = vpop.f32.mrf.mxu0 }
 0x421   :  { %v1511_v3 = vpack.c.bf16 %v3304_v46, %v3302_v44 }
 0x422   :  { %v986_v48 = vpop.f32.mrf.mxu1 }
 0x423   :  { %v1028_v4 = vmul.f32 %v3308_v24, %v986_v48 }
 0x425   :  { %v1046_v57 = vadd.f32 %v3311_v52, %v1028_v4 }
 0x427   :  { %v1062_v1 = vmax.f32 %v1046_v57, 0.0 }
 0x428   :  { %v3313_v11 = vpop.f32.mrf.mxu0 }
 0x42a   :  { %v988_v54 = vpop.f32.mrf.mxu1 }
 0x42b   :  { %v1029_v51 = vmul.f32 %v3308_v24, %v988_v54 }
 0x42d   :  { %v1047_v62 = vadd.f32 %v3311_v52, %v1029_v51 }
 0x42f   :  { %v1063_v59 = vmax.f32 %v1047_v62, 0.0 }
 0x430   :  { %v3318_v63 = vpop.f32.mrf.mxu0 }
 0x431   :  { %v1620_v26 = vpack.c.bf16 %v1063_v59, %v1062_v1  ;;  %v1512_v27 = vpack.c.bf16 %v3318_v63, %v3313_v11 }
 0x432   :  { %v991_v2 = vpop.f32.mrf.mxu1 }
 0x433   :  { %1703 = vmatmul.bf16.vlgmr.msra.gmra.mxu2 %v1620_v26  ;;  %v1030_v5 = vmul.f32 %v3308_v24, %v991_v2 }
 0x435   :  { %v1048_v28 = vadd.f32 %v3311_v52, %v1030_v5 }
 0x437   :  { %v1064_v23 = vmax.f32 %v1048_v28, 0.0 }
 0x438   :  { %v3323_v15 = vpop.f32.mrf.mxu0 }
 0x43a   :  { %v993_v17 = vpop.f32.mrf.mxu1 }
 0x43b   :  { %v1031_v14 = vmul.f32 %v3308_v24, %v993_v17 }
 0x43d   :  { %v1049_v21 = vadd.f32 %v3311_v52, %v1031_v14 }
 0x43f   :  { %v1065_v20 = vmax.f32 %v1049_v21, 0.0 }
 0x440   :  { %v3328_v12 = vpop.f32.mrf.mxu0 }
 0x441   :  { %v1513_v32 = vpack.c.bf16 %v3328_v12, %v3323_v15  ;;  %v1621_v8 = vpack.c.bf16 %v1065_v20, %v1064_v23 }
 0x442   :  { %v996_v34 = vpop.f32.mrf.mxu1 }
 0x443   :  { %1708 = vmatmul.bf16.gmra.mxu2 %v1621_v8  ;;  %v1032_v9 = vmul.f32 %v3308_v24, %v996_v34 }
 0x445   :  { %v1050_v40 = vadd.f32 %v3311_v52, %v1032_v9 }
 0x447   :  { %v1066_v30 = vmax.f32 %v1050_v40, 0.0 }
 0x448   :  { %v3333_v50 = vpop.f32.mrf.mxu0 }
 0x44a   :  { %v998_v47 = vpop.f32.mrf.mxu1 }
 0x44b   :  { %v1033_v39 = vmul.f32 %v3308_v24, %v998_v47 }
 0x44d   :  { %v1051_v13 = vadd.f32 %v3311_v52, %v1033_v39 }
 0x44f   :  { %v1067_v10 = vmax.f32 %v1051_v13, 0.0 }
 0x450   :  { %v3338_v29 = vpop.f32.mrf.mxu0 }
 0x451   :  { %v1514_v36 = vpack.c.bf16 %v3338_v29, %v3333_v50  ;;  %v1622_v6 = vpack.c.bf16 %v1067_v10, %v1066_v30 }
 0x452   :  { %v1001_v42 = vpop.f32.mrf.mxu1 }
 0x453   :  { %1713 = vmatmul.bf16.gmra.mxu2 %v1622_v6  ;;  %v1034_v55 = vmul.f32 %v3308_v24, %v1001_v42 }
 0x455   :  { %v1052_v33 = vadd.f32 %v3311_v52, %v1034_v55 }
 0x457   :  { %v1068_v38 = vmax.f32 %v1052_v33, 0.0 }
 0x458   :  { %v1491_v43 = vpop.f32.mrf.mxu0 }
 0x45a   :  { %v1003_v53 = vpop.f32.mrf.mxu1 }
 0x45b   :  { %v1035_v37 = vmul.f32 %v3308_v24, %v1003_v53 }
 0x45d   :  { %v1053_v45 = vadd.f32 %v3311_v52, %v1035_v37 }
 0x45f   :  { %v1069_v49 = vmax.f32 %v1053_v45, 0.0 }
 0x460   :  { %v1493_v56 = vpop.f32.mrf.mxu0 }
 0x461   :  { %v1623_v60 = vpack.c.bf16 %v1069_v49, %v1068_v38 }
 0x462   :  { %v1006_v0 = vpop.f32.mrf.mxu1 }
 0x463   :  { %1718 = vmatmul.bf16.gmra.mxu2 %v1623_v60  ;;  %v1036_v58 = vmul.f32 %v3308_v24, %v1006_v0 }
 0x465   :  { %v1054_v48 = vadd.f32 %v3311_v52, %v1036_v58  ;;  %v1515_v58 = vpack.c.bf16 %v1493_v56, %v1491_v43 }
 0x467   :  { %v1070_v57 = vmax.f32 %v1054_v48, 0.0 }
 0x468   :  { %v1496_v16 = vpop.f32.mrf.mxu0 }
 0x46a   :  { %v1008_v22 = vpop.f32.mrf.mxu1 }
 0x46b   :  { %v1037_v4 = vmul.f32 %v3308_v24, %v1008_v22 }
 0x46d   :  { %v1055_v54 = vadd.f32 %v3311_v52, %v1037_v4 }
 0x46f   :  { %v1071_v51 = vmax.f32 %v1055_v54, 0.0 }
 0x470   :  { %v1498_v62 = vpop.f32.mrf.mxu0 }
 0x471   :  { %v1624_v1 = vpack.c.bf16 %v1071_v51, %v1070_v57  ;;  %v1516_v38 = vpack.c.bf16 %v1498_v62, %v1496_v16 }
 0x472   :  { %v1011_v59 = vpop.f32.mrf.mxu1 }
 0x473   :  { %1723 = vmatmul.bf16.gmra.mxu2 %v1624_v1  ;;  %v1038_v26 = vmul.f32 %v3308_v24, %v1011_v59  ;;  %v2506_v1 = vld [vmem:[#allocation13 + $0x1f8] sm:$0xff]  ;;  %v2505_v59 = vld [vmem:[#allocation13 + $0x1f0] sm:$0xff] }
 0x474   :  { %1819 = vmatpush.bf16.msrb.mxu3 %v2506_v1 }
 0x475   :  { %v1056_v17 = vadd.f32 %v3311_v52, %v1038_v26 }
 0x477   :  { %v1072_v21 = vmax.f32 %v1056_v17, 0.0  ;;  %v2502_v17 = vld [vmem:[#allocation13 + $0x1d8] sm:$0xff] }
 0x478   :  { %v1501_v2 = vpop.f32.mrf.mxu0  ;;  %1820 = vmatpush.bf16.msrb.mxu3 %v2505_v59 }
 0x47a   :  { %v1013_v5 = vpop.f32.mrf.mxu1 }
 0x47b   :  { %v1039_v28 = vmul.f32 %v3308_v24, %v1013_v5 }
 0x47d   :  { %v1057_v14 = vadd.f32 %v3311_v52, %v1039_v28  ;;  %v2501_v28 = vld [vmem:[#allocation13 + $0x1d0] sm:$0xff] }
 0x47f   :  { %v1073_v23 = vmax.f32 %v1057_v14, 0.0  ;;  %v2500_v14 = vld [vmem:[#allocation13 + $0x1c8] sm:$0xff] }
 0x480   :  { %v1503_v20 = vpop.f32.mrf.mxu0 }
 0x481   :  { %v1625_v8 = vpack.c.bf16 %v1073_v23, %v1072_v21  ;;  %v1517_v37 = vpack.c.bf16 %v1503_v20, %v1501_v2  ;;  %v2504_v2 = vld [vmem:[#allocation13 + $0x1e8] sm:$0xff]  ;;  %v2499_v21 = vld [vmem:[#allocation13 + $0x1c0] sm:$0xff] }
 0x482   :  { %v1016_v34 = vpop.f32.mrf.mxu1  ;;  %1821 = vmatpush.bf16.msrb.mxu3 %v2504_v2 }
 0x483   :  { %1728 = vmatmul.bf16.gmra.mxu2 %v1625_v8  ;;  %v1040_v9 = vmul.f32 %v3308_v24, %v1016_v34 }
 0x485   :  { %v1058_v39 = vadd.f32 %v3311_v52, %v1040_v9 }
 0x487   :  { %v1074_v10 = vmax.f32 %v1058_v39, 0.0 }
 0x488   :  { %v1506_v47 = vpop.f32.mrf.mxu0 }
 0x48a   :  { %v1018_v40 = vpop.f32.mrf.mxu1 }
 0x48b   :  { %v1041_v13 = vmul.f32 %v3308_v24, %v1018_v40 }
 0x48d   :  { %v1059_v30 = vadd.f32 %v3311_v52, %v1041_v13 }
 0x48f   :  { %v1075_v6 = vmax.f32 %v1059_v30, 0.0  ;;  %v3417_v30 = vld [vmem:[#allocation14 + $0xd] ss:$0 sm:$0xff] }
 0x490   :  { %v1508_v42 = vpop.f32.mrf.mxu0 }
 0x491   :  { %v1518_v55 = vpack.c.bf16 %v1508_v42, %v1506_v47  ;;  %v1626_v53 = vpack.c.bf16 %v1075_v6, %v1074_v10  ;;  %v3412_v47 = vld [vmem:[#allocation14 + $0xc] ss:$0 sm:$0xff] }
 0x492   :  { %v1021_v33 = vpop.f32.mrf.mxu1 }
 0x493   :  { %1519 = vmatpush.bf16.msra.mxu1 %v1518_v55  ;;  %1733 = vmatmul.bf16.gmra.mxu2 %v1626_v53  ;;  %v1042_v45 = vmul.f32 %v3308_v24, %v1021_v33 }
 0x495   :  { %v1060_v60 = vadd.f32 %v3311_v52, %v1042_v45 }
 0x497   :  { %1520 = vmatpush.bf16.msra.mxu1 %v1517_v37  ;;  %v1076_v48 = vmax.f32 %v1060_v60, 0.0 }
 0x49a   :  { %v1023_v49 = vpop.f32.mrf.mxu1 }
 0x49b   :  { %v1043_v0 = vmul.f32 %v3308_v24, %v1023_v49  ;;  %1521 = vmatpush.bf16.msra.mxu1 %v1516_v38 }
 0x49d   :  { %v1061_v22 = vadd.f32 %v3311_v52, %v1043_v0  ;;  %v3375_v52 = vld [vmem:[#allocation14 + $0xe] ss:$0 sm:$0xff] }
 0x49f   :  { %v1077_v4 = vmax.f32 %v1061_v22, 0.0  ;;  %1522 = vmatpush.bf16.msra.mxu1 %v1515_v58 }
 0x4a1   :  { %v1627_v54 = vpack.c.bf16 %v1077_v4, %v1076_v48 }
 0x4a3   :  { %1523 = vmatpush.bf16.msra.mxu1 %v1514_v36  ;;  %1738 = vmatmul.bf16.gmra.mxu2 %v1627_v54 }
 0x4a7   :  { %1524 = vmatpush.bf16.msra.mxu1 %v1513_v32 }
 0x4ab   :  { %1525 = vmatpush.bf16.msra.mxu1 %v1512_v27 }
 0x4af   :  { %1526 = vmatpush.bf16.msra.mxu1 %v1511_v3 }
 0x4b2   :  { %1527 = vmatmul.bf16.vlgmr.msra.gmra.mxu1 %v3156_v61 }
 0x4b6   :  { %v1704_v24 = vpop.f32.mrf.mxu2 }
 0x4b7   :  { %v3378_v29 = vadd.f32 %v3375_v52, %v1704_v24 }
 0x4be   :  { %v1706_v50 = vpop.f32.mrf.mxu2 }
 0x4bf   :  { %v3381_v15 = vadd.f32 %v3375_v52, %v1706_v50 }
 0x4c1   :  { %v1869_v11 = vpack.c.bf16 %v3381_v15, %v3378_v29 }
 0x4c2   :  { %1532 = vmatmul.bf16.gmra.mxu1 %v3167_v18 }
 0x4c6   :  { %v1709_v63 = vpop.f32.mrf.mxu2 }
 0x4c7   :  { %v3387_v46 = vadd.f32 %v3375_v52, %v1709_v63 }
 0x4ce   :  { %v1711_v44 = vpop.f32.mrf.mxu2 }
 0x4cf   :  { %v3390_v61 = vadd.f32 %v3375_v52, %v1711_v44 }
 0x4d1   :  { %v1870_v3 = vpack.c.bf16 %v3390_v61, %v3387_v46 }
 0x4d2   :  { %1537 = vmatmul.bf16.gmra.mxu1 %v3176_v19 }
 0x4d6   :  { %v1714_v27 = vpop.f32.mrf.mxu2 }
 0x4d7   :  { %v3396_v32 = vadd.f32 %v3375_v52, %v1714_v27 }
 0x4de   :  { %v1716_v12 = vpop.f32.mrf.mxu2 }
 0x4df   :  { %v3399_v18 = vadd.f32 %v3375_v52, %v1716_v12 }
 0x4e1   :  { %v1871_v36 = vpack.c.bf16 %v3399_v18, %v3396_v32 }
 0x4e2   :  { %1542 = vmatmul.bf16.gmra.mxu1 %v3185_v25  ;;  %v2503_v25 = vld [vmem:[#allocation13 + $0x1e0] sm:$0xff] }
 0x4e3   :  { %1822 = vmatpush.bf16.msrb.mxu3 %v2503_v25 }
 0x4e6   :  { %v1719_v43 = vpop.f32.mrf.mxu2 }
 0x4e7   :  { %v1720_v16 = vadd.f32 %v3375_v52, %v1719_v43  ;;  %1823 = vmatpush.bf16.msrb.mxu3 %v2502_v17 }
 0x4eb   :  { %1824 = vmatpush.bf16.msrb.mxu3 %v2501_v28 }
 0x4ee   :  { %v1721_v56 = vpop.f32.mrf.mxu2 }
 0x4ef   :  { %v1722_v57 = vadd.f32 %v3375_v52, %v1721_v56  ;;  %1825 = vmatpush.bf16.msrb.mxu3 %v2500_v14 }
 0x4f1   :  { %v1872_v19 = vpack.c.bf16 %v1722_v57, %v1720_v16 }
 0x4f2   :  { %1547 = vmatmul.bf16.gmra.mxu1 %v3194_v41 }
 0x4f3   :  { %1826 = vmatpush.bf16.msrb.mxu3 %v2499_v21 }
 0x4f6   :  { %v1724_v51 = vpop.f32.mrf.mxu2 }
 0x4f7   :  { %v1725_v38 = vadd.f32 %v3375_v52, %v1724_v51 }
 0x4fe   :  { %v1726_v62 = vpop.f32.mrf.mxu2 }
 0x4ff   :  { %v1727_v33 = vadd.f32 %v3375_v52, %v1726_v62 }
 0x501   :  { %v1873_v0 = vpack.c.bf16 %v1727_v33, %v1725_v38 }
 0x502   :  { %1552 = vmatmul.bf16.gmra.mxu1 %v3203_v31 }
 0x506   :  { %v1729_v26 = vpop.f32.mrf.mxu2 }
 0x507   :  { %v1730_v6 = vadd.f32 %v3375_v52, %v1729_v26 }
 0x50e   :  { %v1731_v5 = vpop.f32.mrf.mxu2 }
 0x512   :  { %1557 = vmatmul.bf16.gmra.mxu1 %v3212_v35 }
 0x516   :  { %v1734_v41 = vpop.f32.mrf.mxu2 }
 0x517   :  { %v1735_v39 = vadd.f32 %v3375_v52, %v1734_v41 }
 0x51e   :  { %v1736_v31 = vpop.f32.mrf.mxu2 }
 0x51f   :  { %v1737_v35 = vadd.f32 %v3375_v52, %v1736_v31 }
 0x521   :  { %v1875_v10 = vpack.c.bf16 %v1737_v35, %v1735_v39 }
 0x522   :  { %1562 = vmatmul.bf16.gmra.mxu1 %v3221_v7  ;;  %v1732_v7 = vadd.f32 %v3375_v52, %v1731_v5 }
 0x524   :  { %v1874_v37 = vpack.c.bf16 %v1732_v7, %v1730_v6 }
 0x526   :  { %v1739_v23 = vpop.f32.mrf.mxu2 }
 0x527   :  { %v1740_v8 = vadd.f32 %v3375_v52, %v1739_v23 }
 0x52e   :  { %v1741_v20 = vpop.f32.mrf.mxu2 }
 0x52f   :  { %v1742_v34 = vadd.f32 %v3375_v52, %v1741_v20  ;;  %v1528_v9 = vpop.f32.mrf.mxu1 }
 0x530   :  { %v1570_v13 = vmul.f32 %v3412_v47, %v1528_v9 }
 0x531   :  { %v1876_v40 = vpack.c.bf16 %v1742_v34, %v1740_v8 }
 0x532   :  { %v1588_v55 = vadd.f32 %v3417_v30, %v1570_v13 }
 0x533   :  { %1877 = vmatpush.bf16.msra.mxu0 %v1876_v40 }
 0x534   :  { %v1604_v49 = vmax.f32 %v1588_v55, 0.0 }
 0x537   :  { %v1530_v42 = vpop.f32.mrf.mxu1  ;;  %1878 = vmatpush.bf16.msra.mxu0 %v1875_v10 }
 0x538   :  { %v1571_v53 = vmul.f32 %v3412_v47, %v1530_v42 }
 0x53a   :  { %v1589_v45 = vadd.f32 %v3417_v30, %v1571_v53 }
 0x53b   :  { %1879 = vmatpush.bf16.msra.mxu0 %v1874_v37 }
 0x53c   :  { %v1605_v60 = vmax.f32 %v1589_v45, 0.0 }
 0x53e   :  { %v1744_v58 = vpack.c.bf16 %v1605_v60, %v1604_v49 }
 0x53f   :  { %v1533_v22 = vpop.f32.mrf.mxu1  ;;  %1880 = vmatpush.bf16.msra.mxu0 %v1873_v0 }
 0x540   :  { %1827 = vmatmul.bf16.vlgmr.msrb.gmra.mxu3 %v1744_v58  ;;  %v1572_v48 = vmul.f32 %v3412_v47, %v1533_v22 }
 0x542   :  { %v1590_v54 = vadd.f32 %v3417_v30, %v1572_v48 }
 0x543   :  { %1881 = vmatpush.bf16.msra.mxu0 %v1872_v19 }
 0x544   :  { %v1606_v50 = vmax.f32 %v1590_v54, 0.0 }
 0x547   :  { %v1535_v4 = vpop.f32.mrf.mxu1  ;;  %1882 = vmatpush.bf16.msra.mxu0 %v1871_v36 }
 0x548   :  { %v1573_v24 = vmul.f32 %v3412_v47, %v1535_v4  ;;  %v2559_v4 = vld [vmem:[#allocation14 + $0xf] ss:$0 sm:$0xff] }
 0x54a   :  { %v1591_v52 = vadd.f32 %v3417_v30, %v1573_v24 }
 0x54b   :  { %1883 = vmatpush.bf16.msra.mxu0 %v1870_v3 }
 0x54c   :  { %v1607_v63 = vmax.f32 %v1591_v52, 0.0 }
 0x54e   :  { %v1745_v44 = vpack.c.bf16 %v1607_v63, %v1606_v50 }
 0x54f   :  { %v1538_v27 = vpop.f32.mrf.mxu1  ;;  %1884 = vmatpush.bf16.msra.mxu0 %v1869_v11 }
 0x550   :  { %1832 = vmatmul.bf16.gmra.mxu3 %v1745_v44  ;;  %v1574_v12 = vmul.f32 %v3412_v47, %v1538_v27 }
 0x552   :  { %v1592_v18 = vadd.f32 %v3417_v30, %v1574_v12 }
 0x554   :  { %v1608_v46 = vmax.f32 %v1592_v18, 0.0 }
 0x557   :  { %v1540_v32 = vpop.f32.mrf.mxu1 }
 0x558   :  { %v1575_v36 = vmul.f32 %v3412_v47, %v1540_v32 }
 0x55a   :  { %v1593_v43 = vadd.f32 %v3417_v30, %v1575_v36 }
 0x55c   :  { %v1609_v61 = vmax.f32 %v1593_v43, 0.0 }
 0x55e   :  { %v1746_v3 = vpack.c.bf16 %v1609_v61, %v1608_v46 }
 0x55f   :  { %v1543_v56 = vpop.f32.mrf.mxu1 }
 0x560   :  { %1837 = vmatmul.bf16.gmra.mxu3 %v1746_v3  ;;  %v1576_v16 = vmul.f32 %v3412_v47, %v1543_v56 }
 0x562   :  { %v1594_v29 = vadd.f32 %v3417_v30, %v1576_v16 }
 0x564   :  { %v1610_v19 = vmax.f32 %v1594_v29, 0.0 }
 0x567   :  { %v1545_v57 = vpop.f32.mrf.mxu1 }
 0x568   :  { %v1577_v15 = vmul.f32 %v3412_v47, %v1545_v57 }
 0x56a   :  { %v1595_v11 = vadd.f32 %v3417_v30, %v1577_v15 }
 0x56c   :  { %v1611_v51 = vmax.f32 %v1595_v11, 0.0 }
 0x56e   :  { %v1747_v62 = vpack.c.bf16 %v1611_v51, %v1610_v19 }
 0x56f   :  { %v1548_v1 = vpop.f32.mrf.mxu1 }
 0x570   :  { %1842 = vmatmul.bf16.gmra.mxu3 %v1747_v62  ;;  %v1578_v59 = vmul.f32 %v3412_v47, %v1548_v1 }
 0x572   :  { %v1596_v2 = vadd.f32 %v3417_v30, %v1578_v59 }
 0x574   :  { %v1612_v17 = vmax.f32 %v1596_v2, 0.0 }
 0x577   :  { %v1550_v26 = vpop.f32.mrf.mxu1 }
 0x578   :  { %v1579_v25 = vmul.f32 %v3412_v47, %v1550_v26 }
 0x57a   :  { %v1597_v5 = vadd.f32 %v3417_v30, %v1579_v25 }
 0x57c   :  { %v1613_v28 = vmax.f32 %v1597_v5, 0.0 }
 0x57e   :  { %v1748_v41 = vpack.c.bf16 %v1613_v28, %v1612_v17 }
 0x57f   :  { %v1553_v14 = vpop.f32.mrf.mxu1 }
 0x580   :  { %1847 = vmatmul.bf16.gmra.mxu3 %v1748_v41  ;;  %v1580_v21 = vmul.f32 %v3412_v47, %v1553_v14 }
 0x582   :  { %v1598_v23 = vadd.f32 %v3417_v30, %v1580_v21 }
 0x584   :  { %v1614_v34 = vmax.f32 %v1598_v23, 0.0 }
 0x587   :  { %v1555_v31 = vpop.f32.mrf.mxu1 }
 0x588   :  { %v1581_v20 = vmul.f32 %v3412_v47, %v1555_v31 }
 0x58a   :  { %v1599_v8 = vadd.f32 %v3417_v30, %v1581_v20  ;;  %v2507_v20 = vld [vmem:[#allocation11] sm:$0xff] }
 0x58c   :  { %v1615_v9 = vmax.f32 %v1599_v8, 0.0  ;;  %v2508_v8 = vld [vmem:[#allocation11 + $0x8] sm:$0xff] }
 0x58e   :  { %v1749_v35 = vpack.c.bf16 %v1615_v9, %v1614_v34  ;;  %v2509_v34 = vld [vmem:[#allocation11 + $0x10] sm:$0xff]  ;;  %v2510_v9 = vld [vmem:[#allocation11 + $0x18] sm:$0xff] }
 0x58f   :  { %v1558_v40 = vpop.f32.mrf.mxu1 }
 0x590   :  { %1852 = vmatmul.bf16.gmra.mxu3 %v1749_v35  ;;  %v1582_v39 = vmul.f32 %v3412_v47, %v1558_v40  ;;  %v2511_v35 = vld [vmem:[#allocation11 + $0x20] sm:$0xff]  ;;  %v2512_v40 = vld [vmem:[#allocation11 + $0x28] sm:$0xff] }
 0x592   :  { %v1600_v7 = vadd.f32 %v3417_v30, %v1582_v39  ;;  %v2513_v39 = vld [vmem:[#allocation11 + $0x30] sm:$0xff] }
 0x594   :  { %v1616_v42 = vmax.f32 %v1600_v7, 0.0 }
 0x597   :  { %v1560_v13 = vpop.f32.mrf.mxu1 }
 0x598   :  { %v1583_v10 = vmul.f32 %v3412_v47, %v1560_v13  ;;  %v2514_v13 = vld [vmem:[#allocation11 + $0x38] sm:$0xff] }
 0x59a   :  { %v1601_v6 = vadd.f32 %v3417_v30, %v1583_v10 }
 0x59c   :  { %v1617_v55 = vmax.f32 %v1601_v6, 0.0 }
 0x59e   :  { %v1750_v53 = vpack.c.bf16 %v1617_v55, %v1616_v42  ;;  %v1868_v55 = vld [vmem:[#allocation10] sm:$0xf] }
 0x59f   :  { %v1563_v33 = vpop.f32.mrf.mxu1  ;;  %1885 = vmatmul.bf16.vlgmr.msra.gmra.mxu0 %v1868_v55 }
 0x5a0   :  { %1857 = vmatmul.bf16.gmra.mxu3 %v1750_v53  ;;  %v1584_v37 = vmul.f32 %v3412_v47, %v1563_v33 }
 0x5a2   :  { %v1602_v38 = vadd.f32 %v3417_v30, %v1584_v37 }
 0x5a4   :  { %v1618_v0 = vmax.f32 %v1602_v38, 0.0 }
 0x5a7   :  { %v1565_v45 = vpop.f32.mrf.mxu1 }
 0x5a8   :  { %v1585_v49 = vmul.f32 %v3412_v47, %v1565_v45 }
 0x5aa   :  { %v1603_v60 = vadd.f32 %v3417_v30, %v1585_v49 }
 0x5ac   :  { %v1619_v58 = vmax.f32 %v1603_v60, 0.0 }
 0x5ae   :  { %v1751_v22 = vpack.c.bf16 %v1619_v58, %v1618_v0 }
 0x5b0   :  { %1862 = vmatmul.bf16.gmra.mxu3 %v1751_v22 }
 0x5c3   :  { %v1828_v48 = vpop.f32.mrf.mxu3 }
 0x5c4   :  { %v1829_v24 = vadd.f32 %v2559_v4, %v1828_v48 }
 0x5cb   :  { %v1830_v54 = vpop.f32.mrf.mxu3 }
 0x5cc   :  { %v1831_v52 = vadd.f32 %v2559_v4, %v1830_v54 }
 0x5ce   :  { %v1906_v50 = vpack.c.bf16 %v1831_v52, %v1829_v24 }
 0x5d3   :  { %v1833_v63 = vpop.f32.mrf.mxu3 }
 0x5d4   :  { %v1834_v27 = vadd.f32 %v2559_v4, %v1833_v63 }
 0x5db   :  { %v1835_v44 = vpop.f32.mrf.mxu3 }
 0x5dc   :  { %v1836_v12 = vadd.f32 %v2559_v4, %v1835_v44 }
 0x5de   :  { %v1907_v32 = vpack.c.bf16 %v1836_v12, %v1834_v27 }
 0x5e3   :  { %v1838_v18 = vpop.f32.mrf.mxu3 }
 0x5e4   :  { %v1839_v47 = vadd.f32 %v2559_v4, %v1838_v18 }
 0x5eb   :  { %v1840_v36 = vpop.f32.mrf.mxu3 }
 0x5ec   :  { %v1841_v43 = vadd.f32 %v2559_v4, %v1840_v36 }
 0x5ee   :  { %v1908_v30 = vpack.c.bf16 %v1841_v43, %v1839_v47 }
 0x5f3   :  { %v1843_v46 = vpop.f32.mrf.mxu3 }
 0x5f4   :  { %v1844_v3 = vadd.f32 %v2559_v4, %v1843_v46 }
 0x5fb   :  { %v1845_v61 = vpop.f32.mrf.mxu3 }
 0x5fc   :  { %v1846_v56 = vadd.f32 %v2559_v4, %v1845_v61 }
 0x5fe   :  { %v1909_v16 = vpack.c.bf16 %v1846_v56, %v1844_v3 }
 0x603   :  { %v1848_v57 = vpop.f32.mrf.mxu3 }
 0x604   :  { %v1849_v31 = vadd.f32 %v2559_v4, %v1848_v57 }
 0x60b   :  { %v1850_v29 = vpop.f32.mrf.mxu3 }
 0x60c   :  { %v1851_v14 = vadd.f32 %v2559_v4, %v1850_v29 }
 0x60e   :  { %v1910_v23 = vpack.c.bf16 %v1851_v14, %v1849_v31 }
 0x613   :  { %v1853_v15 = vpop.f32.mrf.mxu3 }
 0x614   :  { %v1854_v41 = vadd.f32 %v2559_v4, %v1853_v15 }
 0x61b   :  { %v1855_v11 = vpop.f32.mrf.mxu3 }
 0x61c   :  { %v1856_v17 = vadd.f32 %v2559_v4, %v1855_v11 }
 0x61e   :  { %v1911_v21 = vpack.c.bf16 %v1856_v17, %v1854_v41 }
 0x623   :  { %v1858_v19 = vpop.f32.mrf.mxu3 }
 0x624   :  { %v1859_v5 = vadd.f32 %v2559_v4, %v1858_v19 }
 0x62b   :  { %v1860_v51 = vpop.f32.mrf.mxu3 }
 0x62c   :  { %v1861_v2 = vadd.f32 %v2559_v4, %v1860_v51 }
 0x62e   :  { %v1912_v28 = vpack.c.bf16 %v1861_v2, %v1859_v5 }
 0x633   :  { %v1863_v62 = vpop.f32.mrf.mxu3 }
 0x634   :  { %v1864_v59 = vadd.f32 %v2559_v4, %v1863_v62 }
 0x63b   :  { %v1865_v1 = vpop.f32.mrf.mxu3 }
 0x63c   :  { %v1866_v26 = vadd.f32 %v2559_v4, %v1865_v1 }
 0x63e   :  { %v1913_v25 = vpack.c.bf16 %v1866_v26, %v1864_v59 }
 0x640   :  { %1962 = vmatpush.bf16.msrb.mxu1 %v1913_v25 }
 0x644   :  { %1963 = vmatpush.bf16.msrb.mxu1 %v1912_v28 }
 0x648   :  { %1964 = vmatpush.bf16.msrb.mxu1 %v1911_v21 }
 0x64c   :  { %1965 = vmatpush.bf16.msrb.mxu1 %v1910_v23 }
 0x650   :  { %1966 = vmatpush.bf16.msrb.mxu1 %v1909_v16 }
 0x654   :  { %1967 = vmatpush.bf16.msrb.mxu1 %v1908_v30 }
 0x658   :  { %1968 = vmatpush.bf16.msrb.mxu1 %v1907_v32  ;;  %v1886_v32 = vpop.f32.mrf.mxu0 }
 0x659   :  { %v2011_v36 = vpack.c.bf16 %v1886_v32, %v1886_v32 }
 0x65c   :  { %1969 = vmatpush.bf16.msrb.mxu1 %v1906_v50 }
 0x65f   :  { %1970 = vmatmul.bf16.vlgmr.msrb.gmra.mxu1 %v2507_v20 }
 0x660   :  { %v1888_v18 = vpop.f32.mrf.mxu0 }
 0x66f   :  { %1975 = vmatmul.bf16.gmra.mxu1 %v2508_v8 }
 0x67f   :  { %1980 = vmatmul.bf16.gmra.mxu1 %v2509_v34 }
 0x68f   :  { %1985 = vmatmul.bf16.gmra.mxu1 %v2510_v9 }
 0x69f   :  { %1990 = vmatmul.bf16.gmra.mxu1 %v2511_v35 }
 0x6af   :  { %1995 = vmatmul.bf16.gmra.mxu1 %v2512_v40 }
 0x6bf   :  { %2000 = vmatmul.bf16.gmra.mxu1 %v2513_v39 }
 0x6cf   :  { %2005 = vmatmul.bf16.gmra.mxu1 %v2514_v13 }
 0x6dc   :  { %v1971_v7 = vpop.f32.mrf.mxu1 }
 0x6e4   :  { %v1973_v10 = vpop.f32.mrf.mxu1 }
 0x6e5   :  { %v2012_v6 = vpack.c.bf16 %v1973_v10, %v1971_v7 }
 0x6ec   :  { %v1976_v42 = vpop.f32.mrf.mxu1 }
 0x6f4   :  { %v1978_v53 = vpop.f32.mrf.mxu1 }
 0x6f5   :  { %v2013_v33 = vpack.c.bf16 %v1978_v53, %v1976_v42 }
 0x6fc   :  { %v1981_v37 = vpop.f32.mrf.mxu1 }
 0x704   :  { %v1983_v45 = vpop.f32.mrf.mxu1 }
 0x705   :  { %v2014_v38 = vpack.c.bf16 %v1983_v45, %v1981_v37 }
 0x70c   :  { %v1986_v49 = vpop.f32.mrf.mxu1 }
 0x714   :  { %v1988_v60 = vpop.f32.mrf.mxu1 }
 0x715   :  { %v2015_v0 = vpack.c.bf16 %v1988_v60, %v1986_v49 }
 0x71c   :  { %v1991_v58 = vpop.f32.mrf.mxu1 }
 0x724   :  { %v1993_v22 = vpop.f32.mrf.mxu1 }
 0x725   :  { %v2016_v48 = vpack.c.bf16 %v1993_v22, %v1991_v58 }
 0x72c   :  { %v1996_v4 = vpop.f32.mrf.mxu1 }
 0x734   :  { %v1998_v54 = vpop.f32.mrf.mxu1 }
 0x735   :  { %v2017_v12 = vpack.c.bf16 %v1998_v54, %v1996_v4 }
 0x73c   :  { %v2001_v24 = vpop.f32.mrf.mxu1 }
 0x744   :  { %v2003_v52 = vpop.f32.mrf.mxu1 }
 0x745   :  { %v2018_v27 = vpack.c.bf16 %v2003_v52, %v2001_v24 }
 0x74c   :  { %v2006_v50 = vpop.f32.mrf.mxu1 }
 0x754   :  { %v2008_v63 = vpop.f32.mrf.mxu1 }
 0x755   :  { %v2019_v44 = vpack.c.bf16 %v2008_v63, %v2006_v50 }
 0x757   :  { %2020 = vmatpush.bf16.xpose.msrb.mxu2 %v2019_v44 }
 0x75f   :  { %2021 = vmatpush.bf16.xpose.msrb.mxu2 %v2018_v27 }
 0x767   :  { %2022 = vmatpush.bf16.xpose.msrb.mxu2 %v2017_v12 }
 0x76f   :  { %2023 = vmatpush.bf16.xpose.msrb.mxu2 %v2016_v48 }
 0x777   :  { %2024 = vmatpush.bf16.xpose.msrb.mxu2 %v2015_v0 }
 0x77f   :  { %2025 = vmatpush.bf16.xpose.msrb.mxu2 %v2014_v38 }
 0x787   :  { %2026 = vmatpush.bf16.xpose.msrb.mxu2 %v2013_v33 }
 0x78f   :  { %2027 = vmatpush.bf16.xpose.msrb.mxu2 %v2012_v6 }
 0x796   :  { %2028 = vmatmul.bf16.vlgmr.msrb.gmra.mxu2 %v2011_v36 }
 0x819   :  { %v2029_v47 = vpop.f32.mrf.mxu2 }
 0x81a   :  { %v2426_v43 = vmul.f32 -1.442695, %v2029_v47 }
 0x81c   :  { %2560 = vpow2.f32 %v2426_v43 }
 0x821   :  { %v2031_v30 = vpop.f32.mrf.mxu2 }
 0x822   :  { %v2561_v46 = vpop.eup %2560 }
 0x823   :  { %v2036_v61 = vadd.f32 1.0, %v2561_v46 }
 0x825   :  { %2562 = vrcp.f32 %v2036_v61  ;;  %v2048_v57 = vand.u32 2147483648, %v2036_v61  ;;  %v2046_v15 = vand.u32 2147483647, %v2036_v61  ;;  %vm2042_vm1 = vweird.f32 %v2036_v61 }
 0x827   :  { %v2049_v19 = vor.u32 1.1754944e-38, %v2048_v57  ;;  %vm2047_vm3 = vcmp.eq.f32.partialorder %v2046_v15, 8.507059e+37 }
 0x82b   :  { %v2563_v3 = vpop.eup %2562 }
 0x82c   :  { %v2038_v56 = vmul.f32 %v2563_v3, %v2036_v61  ;;  %vm2043_vm0 = vweird.f32 %v2563_v3 }
 0x82d   :  { %vm2044_vm2 = vmor %vm2042_vm1, %vm2043_vm0 }
 0x82e   :  { %v2039_v16 = vsub.f32 1.0, %v2038_v56 }
 0x830   :  { %v2040_v29 = vmul.f32 %v2563_v3, %v2039_v16 }
 0x832   :  { %v2041_v11 = vadd.f32 %v2563_v3, %v2040_v29 }
 0x834   :  { %v2045_v51 = vsel %vm2044_vm2, %v2563_v3, %v2041_v11 }
 0x835   :  { %v2050_v62 = vsel %vm2047_vm3, %v2049_v19, %v2045_v51 }
 0x836   :  { %2052 = vst [vmem:[#allocation16] sm:$0xff] %v2050_v62 }
 0x837   :  { %2063 = dma.vmem_to_hbm [thread:$0]  %s2059_s7, 128, %s2061_s21, [#allocation4]  }
 0x838   :  { %2790 = dma.done.wait [#allocation4], 128  }
 0x839   :  { %2791 = vsyncadd [#allocation4], 4294967168 }
 0x83a   :  { %2068 = vsyncpa [#allocation3], 1 }
 0x83b   :  { %2069 = vsyncpa [#allocation6], 1 }
 0x83c   :  { %2070 = vsyncpa [#allocation9], 1 }
 0x83d   :  { %2071 = vsyncpa [#allocation12], 1 }
 0x83e   :  { %2072 = vsyncpa [#allocation15], 1 }
 0x83f   :  { %2073 = vsyncpa [#allocation4], 1 }

</bundles_post_ra>
